<compile_context>
chip_gen: v5e
topology: v5e:2x2
jax: 0.10.0
libtpu: 0.0.40
codegen_flags: <defaults>
</compile_context>

<pallas_src>
import functools

import jax
import jax.numpy as jnp
from jax.experimental import pallas as pl
from jax.experimental.pallas import tpu as pltpu

EMB_DIM = 10
EMB_MAX_NORM = 1.0


def _round_up(x, m):
    return ((x + m - 1) // m) * m


def prepare_cbow_params(emb_tbl, lin_w, lin_b, *, tile_v=2048,
                        weight_dtype=jnp.bfloat16):
    """Pad / transpose / cast the parameters ONCE, outside the jitted forward."""
    V, D = emb_tbl.shape
    D_pad = _round_up(D, 8)                               # 10 -> 16 (contraction)
    tv = min(_round_up(tile_v, 128), _round_up(V, 128))   # lane-aligned V tile
    V_pad = _round_up(V, tv)

    emb_pad = jnp.zeros((V, D_pad), jnp.float32).at[:, :D].set(
        emb_tbl.astype(jnp.float32))                      # stays in HBM
    w_dv = jnp.zeros((D_pad, V_pad), jnp.float32).at[:D, :V].set(
        lin_w.astype(jnp.float32).T).astype(weight_dtype)  # (D_pad, V_pad) bf16
    b_p = jnp.zeros((1, V_pad), jnp.float32).at[0, :V].set(
        lin_b.astype(jnp.float32))
    return emb_pad, w_dv, b_p, tv


@functools.partial(jax.jit, static_argnames=("vocab_size", "tile_v"))
def cbow_forward(indices, emb_pad, w_dv, b_p, *, vocab_size, tile_v):
    B, C = indices.shape
    D_pad = emb_pad.shape[1]
    V_pad = w_dv.shape[1]
    assert V_pad % tile_v == 0
    B_pad = _round_up(max(B, 8), 8)
    n_rows = B * C
    idx_i32 = indices.astype(jnp.int32)

    # ---------- Stage 1: gather + max_norm renorm + mean pool (runs once) ----
    def pool_kernel(idx_ref, emb_hbm, pooled_ref, rows_ref, sems):
        # idx_ref : SMEM (B, C) int32          (scalar-prefetched)
        # emb_hbm : HBM  (V, D_pad) f32        (never copied into VMEM wholesale)
        # pooled  : VMEM (B_pad, D_pad) f32    output
        # rows_ref: VMEM (n_rows, D_pad) f32   gathered context rows
        # sems    : DMA semaphores, one per gathered row
        copies = []
        for i in range(n_rows):            # issue all row DMAs, then wait all
            b, c = divmod(i, C)
            cp = pltpu.make_async_copy(
                emb_hbm.at[pl.ds(idx_ref[b, c], 1), :],
                rows_ref.at[pl.ds(i, 1), :],
                sems.at[i])
            cp.start()
            copies.append(cp)
        for cp in copies:
            cp.wait()

        rows = rows_ref[...]                               # (n_rows, D_pad)
        # Vectorized per-row max_norm renorm (forward-equivalent to PyTorch).
        sq = jnp.sum(rows * rows, axis=1, keepdims=True)
        norm = jnp.sqrt(sq)
        scale = jnp.where(norm > EMB_MAX_NORM,
                          EMB_MAX_NORM / (norm + 1e-7),
                          jnp.ones_like(norm))
        rows = rows * scale

        inv_c = 1.0 / C
        for b in range(B):                                 # mean over context
            seg = rows[b * C:(b + 1) * C, :]
            pooled_ref[pl.ds(b, 1), :] = (
                jnp.sum(seg, axis=0, keepdims=True) * inv_c)
        for b in range(B, B_pad):                          # padded batch rows
            pooled_ref[pl.ds(b, 1), :] = jnp.zeros((1, D_pad), jnp.float32)

    pooled = pl.pallas_call(
        pool_kernel,
        out_shape=jax.ShapeDtypeStruct((B_pad, D_pad), jnp.float32),
        grid_spec=pltpu.PrefetchScalarGridSpec(
            num_scalar_prefetch=1,
            grid=(1,),
            in_specs=[pl.BlockSpec(memory_space=pl.ANY)],   # table stays in HBM
            out_specs=pl.BlockSpec((B_pad, D_pad), lambda i, idx: (0, 0)),
            scratch_shapes=[
                pltpu.VMEM((n_rows, D_pad), jnp.float32),
                pltpu.SemaphoreType.DMA((n_rows,)),
            ],
        ),
        cost_estimate=pl.CostEstimate(
            flops=4 * n_rows * D_pad,
            transcendentals=n_rows,
            bytes_accessed=4 * (n_rows * D_pad + B_pad * D_pad + n_rows)),
    )(idx_i32, emb_pad)

    # ---------- Stage 2: logits = pooled @ W^T + b, large lane-dense V tiles -
    def linear_kernel(pooled_ref, w_ref, b_ref, out_ref):
        x = pooled_ref[...].astype(w_ref.dtype)            # bf16 MXU path
        out_ref[...] = (jnp.dot(x, w_ref[...],
                                preferred_element_type=jnp.float32)
                        + b_ref[...])

    w_itemsize = jnp.dtype(w_dv.dtype).itemsize
    # Per-step double-buffered working set (tiny) + headroom, capped at ~3/4 of
    # this chip's physical VMEM (≈48 MiB on v7x, ≈96 MiB on v5e/v6e).
    est = (2 * B_pad * D_pad * 4 + 2 * D_pad * tile_v * w_itemsize
           + 2 * tile_v * 4 + 2 * B_pad * tile_v * 4)
    try:
        cap = int(pltpu.get_tpu_info().vmem_capacity_bytes)
    except Exception:
        cap = 64 * 1024 * 1024
    vmem_limit = int(min(cap * 3 // 4, max(4 * est, 16 * 1024 * 1024)))

    out = pl.pallas_call(
        linear_kernel,
        out_shape=jax.ShapeDtypeStruct((B_pad, V_pad), jnp.float32),
        grid=(V_pad // tile_v,),
        in_specs=[
            pl.BlockSpec((B_pad, D_pad), lambda j: (0, 0)),    # pooled (tiny)
            pl.BlockSpec((D_pad, tile_v), lambda j: (0, j)),   # W^T tile (bf16)
            pl.BlockSpec((1, tile_v), lambda j: (0, j)),       # bias tile
        ],
        out_specs=pl.BlockSpec((B_pad, tile_v), lambda j: (0, j)),
        compiler_params=pltpu.CompilerParams(
            dimension_semantics=("parallel",),
            vmem_limit_bytes=vmem_limit,
        ),
        cost_estimate=pl.CostEstimate(
            flops=2 * B_pad * D_pad * V_pad,
            transcendentals=0,
            bytes_accessed=(D_pad * V_pad * w_itemsize + 4 * V_pad
                            + 4 * B_pad * D_pad + 4 * B_pad * V_pad)),
    )(pooled, w_dv, b_p)

    return out[:B, :vocab_size]


def cbow_reference(indices, emb_tbl, lin_w, lin_b):
    norm = jnp.linalg.norm(emb_tbl, axis=1, keepdims=True)
    scale = jnp.where(norm > EMB_MAX_NORM, EMB_MAX_NORM / (norm + 1e-7), 1.0)
    emb_n = emb_tbl * scale
    x = emb_n[indices]                  # (B, C, D)
    x = x.mean(axis=1)                  # (B, D)
    return x @ lin_w.T + lin_b          # (B, V)


if __name__ == "__main__":
    vocab_size = 64
    batch = 4
    context = 6

    key = jax.random.PRNGKey(0)
    k_idx, k_emb, k_w, k_b = jax.random.split(key, 4)

    indices = jax.random.randint(k_idx, (batch, context), 0, vocab_size,
                                 dtype=jnp.int32)
    # nn.Embedding init ~ N(0, 1); nn.Linear init ~ U(-1/sqrt(in), 1/sqrt(in))
    emb_tbl = jax.random.normal(k_emb, (vocab_size, EMB_DIM), dtype=jnp.float32)
    bound = 1.0 / (EMB_DIM ** 0.5)
    lin_w = jax.random.uniform(k_w, (vocab_size, EMB_DIM), jnp.float32,
                               -bound, bound)
    lin_b = jax.random.uniform(k_b, (vocab_size,), jnp.float32, -bound, bound)

    # Pad / transpose / cast the parameters once, outside the jitted forward.
    emb_pad, w_dv, b_p, tile_v = prepare_cbow_params(emb_tbl, lin_w, lin_b)

    out = cbow_forward(indices, emb_pad, w_dv, b_p,
                       vocab_size=vocab_size, tile_v=tile_v)
    out = jax.block_until_ready(out)

    ref = cbow_reference(indices, emb_tbl, lin_w, lin_b)
    assert out.shape == (batch, vocab_size)
    # bf16 weight streaming -> validate against the f32 reference with a
    # slightly looser tolerance (logits keep ~3 decimal digits).
    assert jnp.allclose(out, ref, atol=1e-2, rtol=1e-2)

    print("KERNEL_OK")
</pallas_src>

<mosaic_0001>
module attributes {stable_mosaic.version = 11 : i64} {
  func.func @linear_kernel(%arg0: i32, %arg1: memref<8x16xf32, #tpu.memory_space<vmem>>, %arg2: memref<16x128xbf16, #tpu.memory_space<vmem>>, %arg3: memref<1x128xf32, #tpu.memory_space<vmem>>, %arg4: memref<8x128xf32, #tpu.memory_space<vmem>>) attributes {dimension_semantics = [#tpu.dimension_semantics<parallel>], iteration_bounds = array<i64: 1>, scalar_prefetch = 0 : i64, scratch_operands = 0 : i64, tpu.core_type = #tpu.core_type<tc>, window_params = [{pipeline_mode = #tpu.pipeline_mode<synchronous>, transform_indices = @transform_0, window_bounds = array<i64: 8, 16>}, {transform_indices = @transform_1, window_bounds = array<i64: 16, 128>}, {transform_indices = @transform_2, window_bounds = array<i64: 1, 128>}, {transform_indices = @transform_3, window_bounds = array<i64: 8, 128>}]} {
    %c0 = arith.constant 0 : index
    %c0_0 = arith.constant 0 : index
    %0 = vector.load %arg1[%c0, %c0_0] : memref<8x16xf32, #tpu.memory_space<vmem>>, vector<8x16xf32>
    %1 = arith.truncf %0 : vector<8x16xf32> to vector<8x16xbf16>
    %c0_1 = arith.constant 0 : index
    %c0_2 = arith.constant 0 : index
    %2 = vector.load %arg2[%c0_1, %c0_2] : memref<16x128xbf16, #tpu.memory_space<vmem>>, vector<16x128xbf16>
    %cst = arith.constant dense<0.000000e+00> : vector<8x128xf32>
    %3 = tpu.matmul %1, %2, %cst {dimension_numbers = #tpu.dot_dimension_numbers<[1], [0], [0], [1], [0, 0, 1, 1], [], []>} : vector<8x16xbf16>, vector<16x128xbf16>, vector<8x128xf32> -> vector<8x128xf32>
    %c0_3 = arith.constant 0 : index
    %c0_4 = arith.constant 0 : index
    %4 = vector.load %arg3[%c0_3, %c0_4] : memref<1x128xf32, #tpu.memory_space<vmem>>, vector<1x128xf32>
    %5 = vector.broadcast %4 : vector<1x128xf32> to vector<8x128xf32>
    %6 = arith.addf %3, %5 : vector<8x128xf32>
    %c0_5 = arith.constant 0 : index
    %c0_6 = arith.constant 0 : index
    %7 = vector.load %arg4[%c0_5, %c0_6] : memref<8x128xf32, #tpu.memory_space<vmem>>, vector<8x128xf32>
    tpu.vector_store %arg4[%c0_5, %c0_6], %6 {strides = array<i32>} : memref<8x128xf32, #tpu.memory_space<vmem>>, vector<8x128xf32>,
    return
  }
  func.func @transform_0(%arg0: i32) -> (i32, i32) {
    %c0_i32 = arith.constant 0 : i32
    %c0_i32_0 = arith.constant 0 : i32
    %c0_i32_1 = arith.constant 0 : i32
    return %c0_i32, %c0_i32_0 : i32, i32
  }
  func.func @transform_1(%arg0: i32) -> (i32, i32) {
    %c0_i32 = arith.constant 0 : i32
    %c0_i32_0 = arith.constant 0 : i32
    return %c0_i32, %arg0 : i32, i32
  }
  func.func @transform_2(%arg0: i32) -> (i32, i32) {
    %c0_i32 = arith.constant 0 : i32
    %c0_i32_0 = arith.constant 0 : i32
    return %c0_i32, %arg0 : i32, i32
  }
  func.func @transform_3(%arg0: i32) -> (i32, i32) {
    %c0_i32 = arith.constant 0 : i32
    %c0_i32_0 = arith.constant 0 : i32
    return %c0_i32, %arg0 : i32, i32
  }
}

module attributes {stable_mosaic.version = 11 : i64} {
  func.func @pool_kernel(%arg0: i32, %arg1: memref<4x6xi32, #tpu.memory_space<smem>>, %arg2: memref<64x16xf32, #tpu.memory_space<any>>, %arg3: memref<8x16xf32, #tpu.memory_space<vmem>>, %arg4: memref<24x16xf32, #tpu.memory_space<vmem>>, %arg5: memref<24x!tpu.dma_semaphore, #tpu.memory_space<semaphore_mem>>) attributes {dimension_semantics = [#tpu.dimension_semantics<arbitrary>], iteration_bounds = array<i64: 1>, scalar_prefetch = 1 : i64, scratch_operands = 2 : i64, tpu.core_type = #tpu.core_type<tc>, window_params = [{}, {pipeline_mode = #tpu.pipeline_mode<synchronous>, transform_indices = @transform_1, window_bounds = array<i64: 8, 16>}]} {
    %c0 = arith.constant 0 : index
    %c0_0 = arith.constant 0 : index
    %0 = memref.load %arg1[%c0, %c0_0] : memref<4x6xi32, #tpu.memory_space<smem>>
    %c0_i32 = arith.constant 0 : i32
    %c0_i32_1 = arith.constant 0 : i32
    %1 = tpu.memref_slice %arg2[%0, %c0_i32_1] : memref<64x16xf32, #tpu.memory_space<any>> -> memref<1x16xf32, #tpu.memory_space<any>>
    %c0_i32_2 = arith.constant 0 : i32
    %c0_i32_3 = arith.constant 0 : i32
    %2 = tpu.memref_slice %arg4[%c0_i32_2, %c0_i32_3] : memref<24x16xf32, #tpu.memory_space<vmem>> -> memref<1x16xf32, #tpu.memory_space<vmem>>
    %3 = tpu.memref_slice %arg5[%c0_i32] : memref<24x!tpu.dma_semaphore, #tpu.memory_space<semaphore_mem>> -> memref<1x!tpu.dma_semaphore, #tpu.memory_space<semaphore_mem>>
    %4 = tpu.memref_squeeze %3 : memref<1x!tpu.dma_semaphore, #tpu.memory_space<semaphore_mem>> -> memref<!tpu.dma_semaphore, #tpu.memory_space<semaphore_mem>>
    tpu.enqueue_dma source(%1 : memref<1x16xf32, #tpu.memory_space<any>>) target(%2 : memref<1x16xf32, #tpu.memory_space<vmem>>) target_semaphore(%4 : memref<!tpu.dma_semaphore, #tpu.memory_space<semaphore_mem>>)
    %c0_4 = arith.constant 0 : index
    %c1 = arith.constant 1 : index
    %5 = memref.load %arg1[%c0_4, %c1] : memref<4x6xi32, #tpu.memory_space<smem>>
    %c1_i32 = arith.constant 1 : i32
    %c0_i32_5 = arith.constant 0 : i32
    %6 = tpu.memref_slice %arg2[%5, %c0_i32_5] : memref<64x16xf32, #tpu.memory_space<any>> -> memref<1x16xf32, #tpu.memory_space<any>>
    %c1_i32_6 = arith.constant 1 : i32
    %c0_i32_7 = arith.constant 0 : i32
    %7 = tpu.memref_slice %arg4[%c1_i32_6, %c0_i32_7] : memref<24x16xf32, #tpu.memory_space<vmem>> -> memref<1x16xf32, #tpu.memory_space<vmem>>
    %8 = tpu.memref_slice %arg5[%c1_i32] : memref<24x!tpu.dma_semaphore, #tpu.memory_space<semaphore_mem>> -> memref<1x!tpu.dma_semaphore, #tpu.memory_space<semaphore_mem>>
    %9 = tpu.memref_squeeze %8 : memref<1x!tpu.dma_semaphore, #tpu.memory_space<semaphore_mem>> -> memref<!tpu.dma_semaphore, #tpu.memory_space<semaphore_mem>>
    tpu.enqueue_dma source(%6 : memref<1x16xf32, #tpu.memory_space<any>>) target(%7 : memref<1x16xf32, #tpu.memory_space<vmem>>) target_semaphore(%9 : memref<!tpu.dma_semaphore, #tpu.memory_space<semaphore_mem>>)
    %c0_8 = arith.constant 0 : index
    %c2 = arith.constant 2 : index
    %10 = memref.load %arg1[%c0_8, %c2] : memref<4x6xi32, #tpu.memory_space<smem>>
    %c2_i32 = arith.constant 2 : i32
    %c0_i32_9 = arith.constant 0 : i32
    %11 = tpu.memref_slice %arg2[%10, %c0_i32_9] : memref<64x16xf32, #tpu.memory_space<any>> -> memref<1x16xf32, #tpu.memory_space<any>>
    %c2_i32_10 = arith.constant 2 : i32
    %c0_i32_11 = arith.constant 0 : i32
    %12 = tpu.memref_slice %arg4[%c2_i32_10, %c0_i32_11] : memref<24x16xf32, #tpu.memory_space<vmem>> -> memref<1x16xf32, #tpu.memory_space<vmem>>
    %13 = tpu.memref_slice %arg5[%c2_i32] : memref<24x!tpu.dma_semaphore, #tpu.memory_space<semaphore_mem>> -> memref<1x!tpu.dma_semaphore, #tpu.memory_space<semaphore_mem>>
    %14 = tpu.memref_squeeze %13 : memref<1x!tpu.dma_semaphore, #tpu.memory_space<semaphore_mem>> -> memref<!tpu.dma_semaphore, #tpu.memory_space<semaphore_mem>>
    tpu.enqueue_dma source(%11 : memref<1x16xf32, #tpu.memory_space<any>>) target(%12 : memref<1x16xf32, #tpu.memory_space<vmem>>) target_semaphore(%14 : memref<!tpu.dma_semaphore, #tpu.memory_space<semaphore_mem>>)
    %c0_12 = arith.constant 0 : index
    %c3 = arith.constant 3 : index
    %15 = memref.load %arg1[%c0_12, %c3] : memref<4x6xi32, #tpu.memory_space<smem>>
    %c3_i32 = arith.constant 3 : i32
    %c0_i32_13 = arith.constant 0 : i32
    %16 = tpu.memref_slice %arg2[%15, %c0_i32_13] : memref<64x16xf32, #tpu.memory_space<any>> -> memref<1x16xf32, #tpu.memory_space<any>>
    %c3_i32_14 = arith.constant 3 : i32
    %c0_i32_15 = arith.constant 0 : i32
    %17 = tpu.memref_slice %arg4[%c3_i32_14, %c0_i32_15] : memref<24x16xf32, #tpu.memory_space<vmem>> -> memref<1x16xf32, #tpu.memory_space<vmem>>
    %18 = tpu.memref_slice %arg5[%c3_i32] : memref<24x!tpu.dma_semaphore, #tpu.memory_space<semaphore_mem>> -> memref<1x!tpu.dma_semaphore, #tpu.memory_space<semaphore_mem>>
    %19 = tpu.memref_squeeze %18 : memref<1x!tpu.dma_semaphore, #tpu.memory_space<semaphore_mem>> -> memref<!tpu.dma_semaphore, #tpu.memory_space<semaphore_mem>>
    tpu.enqueue_dma source(%16 : memref<1x16xf32, #tpu.memory_space<any>>) target(%17 : memref<1x16xf32, #tpu.memory_space<vmem>>) target_semaphore(%19 : memref<!tpu.dma_semaphore, #tpu.memory_space<semaphore_mem>>)
    %c0_16 = arith.constant 0 : index
    %c4 = arith.constant 4 : index
    %20 = memref.load %arg1[%c0_16, %c4] : memref<4x6xi32, #tpu.memory_space<smem>>
    %c4_i32 = arith.constant 4 : i32
    %c0_i32_17 = arith.constant 0 : i32
    %21 = tpu.memref_slice %arg2[%20, %c0_i32_17] : memref<64x16xf32, #tpu.memory_space<any>> -> memref<1x16xf32, #tpu.memory_space<any>>
    %c4_i32_18 = arith.constant 4 : i32
    %c0_i32_19 = arith.constant 0 : i32
    %22 = tpu.memref_slice %arg4[%c4_i32_18, %c0_i32_19] : memref<24x16xf32, #tpu.memory_space<vmem>> -> memref<1x16xf32, #tpu.memory_space<vmem>>
    %23 = tpu.memref_slice %arg5[%c4_i32] : memref<24x!tpu.dma_semaphore, #tpu.memory_space<semaphore_mem>> -> memref<1x!tpu.dma_semaphore, #tpu.memory_space<semaphore_mem>>
    %24 = tpu.memref_squeeze %23 : memref<1x!tpu.dma_semaphore, #tpu.memory_space<semaphore_mem>> -> memref<!tpu.dma_semaphore, #tpu.memory_space<semaphore_mem>>
    tpu.enqueue_dma source(%21 : memref<1x16xf32, #tpu.memory_space<any>>) target(%22 : memref<1x16xf32, #tpu.memory_space<vmem>>) target_semaphore(%24 : memref<!tpu.dma_semaphore, #tpu.memory_space<semaphore_mem>>)
    %c0_20 = arith.constant 0 : index
    %c5 = arith.constant 5 : index
    %25 = memref.load %arg1[%c0_20, %c5] : memref<4x6xi32, #tpu.memory_space<smem>>
    %c5_i32 = arith.constant 5 : i32
    %c0_i32_21 = arith.constant 0 : i32
    %26 = tpu.memref_slice %arg2[%25, %c0_i32_21] : memref<64x16xf32, #tpu.memory_space<any>> -> memref<1x16xf32, #tpu.memory_space<any>>
    %c5_i32_22 = arith.constant 5 : i32
    %c0_i32_23 = arith.constant 0 : i32
    %27 = tpu.memref_slice %arg4[%c5_i32_22, %c0_i32_23] : memref<24x16xf32, #tpu.memory_space<vmem>> -> memref<1x16xf32, #tpu.memory_space<vmem>>
    %28 = tpu.memref_slice %arg5[%c5_i32] : memref<24x!tpu.dma_semaphore, #tpu.memory_space<semaphore_mem>> -> memref<1x!tpu.dma_semaphore, #tpu.memory_space<semaphore_mem>>
    %29 = tpu.memref_squeeze %28 : memref<1x!tpu.dma_semaphore, #tpu.memory_space<semaphore_mem>> -> memref<!tpu.dma_semaphore, #tpu.memory_space<semaphore_mem>>
    tpu.enqueue_dma source(%26 : memref<1x16xf32, #tpu.memory_space<any>>) target(%27 : memref<1x16xf32, #tpu.memory_space<vmem>>) target_semaphore(%29 : memref<!tpu.dma_semaphore, #tpu.memory_space<semaphore_mem>>)
    %c1_24 = arith.constant 1 : index
    %c0_25 = arith.constant 0 : index
    %30 = memref.load %arg1[%c1_24, %c0_25] : memref<4x6xi32, #tpu.memory_space<smem>>
    %c6_i32 = arith.constant 6 : i32
    %c0_i32_26 = arith.constant 0 : i32
    %31 = tpu.memref_slice %arg2[%30, %c0_i32_26] : memref<64x16xf32, #tpu.memory_space<any>> -> memref<1x16xf32, #tpu.memory_space<any>>
    %c6_i32_27 = arith.constant 6 : i32
    %c0_i32_28 = arith.constant 0 : i32
    %32 = tpu.memref_slice %arg4[%c6_i32_27, %c0_i32_28] : memref<24x16xf32, #tpu.memory_space<vmem>> -> memref<1x16xf32, #tpu.memory_space<vmem>>
    %33 = tpu.memref_slice %arg5[%c6_i32] : memref<24x!tpu.dma_semaphore, #tpu.memory_space<semaphore_mem>> -> memref<1x!tpu.dma_semaphore, #tpu.memory_space<semaphore_mem>>
    %34 = tpu.memref_squeeze %33 : memref<1x!tpu.dma_semaphore, #tpu.memory_space<semaphore_mem>> -> memref<!tpu.dma_semaphore, #tpu.memory_space<semaphore_mem>>
    tpu.enqueue_dma source(%31 : memref<1x16xf32, #tpu.memory_space<any>>) target(%32 : memref<1x16xf32, #tpu.memory_space<vmem>>) target_semaphore(%34 : memref<!tpu.dma_semaphore, #tpu.memory_space<semaphore_mem>>)
    %c1_29 = arith.constant 1 : index
    %c1_30 = arith.constant 1 : index
    %35 = memref.load %arg1[%c1_29, %c1_30] : memref<4x6xi32, #tpu.memory_space<smem>>
    %c7_i32 = arith.constant 7 : i32
    %c0_i32_31 = arith.constant 0 : i32
    %36 = tpu.memref_slice %arg2[%35, %c0_i32_31] : memref<64x16xf32, #tpu.memory_space<any>> -> memref<1x16xf32, #tpu.memory_space<any>>
    %c7_i32_32 = arith.constant 7 : i32
    %c0_i32_33 = arith.constant 0 : i32
    %37 = tpu.memref_slice %arg4[%c7_i32_32, %c0_i32_33] : memref<24x16xf32, #tpu.memory_space<vmem>> -> memref<1x16xf32, #tpu.memory_space<vmem>>
    %38 = tpu.memref_slice %arg5[%c7_i32] : memref<24x!tpu.dma_semaphore, #tpu.memory_space<semaphore_mem>> -> memref<1x!tpu.dma_semaphore, #tpu.memory_space<semaphore_mem>>
    %39 = tpu.memref_squeeze %38 : memref<1x!tpu.dma_semaphore, #tpu.memory_space<semaphore_mem>> -> memref<!tpu.dma_semaphore, #tpu.memory_space<semaphore_mem>>
    tpu.enqueue_dma source(%36 : memref<1x16xf32, #tpu.memory_space<any>>) target(%37 : memref<1x16xf32, #tpu.memory_space<vmem>>) target_semaphore(%39 : memref<!tpu.dma_semaphore, #tpu.memory_space<semaphore_mem>>)
    %c1_34 = arith.constant 1 : index
    %c2_35 = arith.constant 2 : index
    %40 = memref.load %arg1[%c1_34, %c2_35] : memref<4x6xi32, #tpu.memory_space<smem>>
    %c8_i32 = arith.constant 8 : i32
    %c0_i32_36 = arith.constant 0 : i32
    %41 = tpu.memref_slice %arg2[%40, %c0_i32_36] : memref<64x16xf32, #tpu.memory_space<any>> -> memref<1x16xf32, #tpu.memory_space<any>>
    %c8_i32_37 = arith.constant 8 : i32
    %c0_i32_38 = arith.constant 0 : i32
    %42 = tpu.memref_slice %arg4[%c8_i32_37, %c0_i32_38] : memref<24x16xf32, #tpu.memory_space<vmem>> -> memref<1x16xf32, #tpu.memory_space<vmem>>
    %43 = tpu.memref_slice %arg5[%c8_i32] : memref<24x!tpu.dma_semaphore, #tpu.memory_space<semaphore_mem>> -> memref<1x!tpu.dma_semaphore, #tpu.memory_space<semaphore_mem>>
    %44 = tpu.memref_squeeze %43 : memref<1x!tpu.dma_semaphore, #tpu.memory_space<semaphore_mem>> -> memref<!tpu.dma_semaphore, #tpu.memory_space<semaphore_mem>>
    tpu.enqueue_dma source(%41 : memref<1x16xf32, #tpu.memory_space<any>>) target(%42 : memref<1x16xf32, #tpu.memory_space<vmem>>) target_semaphore(%44 : memref<!tpu.dma_semaphore, #tpu.memory_space<semaphore_mem>>)
    %c1_39 = arith.constant 1 : index
    %c3_40 = arith.constant 3 : index
    %45 = memref.load %arg1[%c1_39, %c3_40] : memref<4x6xi32, #tpu.memory_space<smem>>
    %c9_i32 = arith.constant 9 : i32
    %c0_i32_41 = arith.constant 0 : i32
    %46 = tpu.memref_slice %arg2[%45, %c0_i32_41] : memref<64x16xf32, #tpu.memory_space<any>> -> memref<1x16xf32, #tpu.memory_space<any>>
    %c9_i32_42 = arith.constant 9 : i32
    %c0_i32_43 = arith.constant 0 : i32
    %47 = tpu.memref_slice %arg4[%c9_i32_42, %c0_i32_43] : memref<24x16xf32, #tpu.memory_space<vmem>> -> memref<1x16xf32, #tpu.memory_space<vmem>>
    %48 = tpu.memref_slice %arg5[%c9_i32] : memref<24x!tpu.dma_semaphore, #tpu.memory_space<semaphore_mem>> -> memref<1x!tpu.dma_semaphore, #tpu.memory_space<semaphore_mem>>
    %49 = tpu.memref_squeeze %48 : memref<1x!tpu.dma_semaphore, #tpu.memory_space<semaphore_mem>> -> memref<!tpu.dma_semaphore, #tpu.memory_space<semaphore_mem>>
    tpu.enqueue_dma source(%46 : memref<1x16xf32, #tpu.memory_space<any>>) target(%47 : memref<1x16xf32, #tpu.memory_space<vmem>>) target_semaphore(%49 : memref<!tpu.dma_semaphore, #tpu.memory_space<semaphore_mem>>)
    %c1_44 = arith.constant 1 : index
    %c4_45 = arith.constant 4 : index
    %50 = memref.load %arg1[%c1_44, %c4_45] : memref<4x6xi32, #tpu.memory_space<smem>>
    %c10_i32 = arith.constant 10 : i32
    %c0_i32_46 = arith.constant 0 : i32
    %51 = tpu.memref_slice %arg2[%50, %c0_i32_46] : memref<64x16xf32, #tpu.memory_space<any>> -> memref<1x16xf32, #tpu.memory_space<any>>
    %c10_i32_47 = arith.constant 10 : i32
    %c0_i32_48 = arith.constant 0 : i32
    %52 = tpu.memref_slice %arg4[%c10_i32_47, %c0_i32_48] : memref<24x16xf32, #tpu.memory_space<vmem>> -> memref<1x16xf32, #tpu.memory_space<vmem>>
    %53 = tpu.memref_slice %arg5[%c10_i32] : memref<24x!tpu.dma_semaphore, #tpu.memory_space<semaphore_mem>> -> memref<1x!tpu.dma_semaphore, #tpu.memory_space<semaphore_mem>>
    %54 = tpu.memref_squeeze %53 : memref<1x!tpu.dma_semaphore, #tpu.memory_space<semaphore_mem>> -> memref<!tpu.dma_semaphore, #tpu.memory_space<semaphore_mem>>
    tpu.enqueue_dma source(%51 : memref<1x16xf32, #tpu.memory_space<any>>) target(%52 : memref<1x16xf32, #tpu.memory_space<vmem>>) target_semaphore(%54 : memref<!tpu.dma_semaphore, #tpu.memory_space<semaphore_mem>>)
    %c1_49 = arith.constant 1 : index
    %c5_50 = arith.constant 5 : index
    %55 = memref.load %arg1[%c1_49, %c5_50] : memref<4x6xi32, #tpu.memory_space<smem>>
    %c11_i32 = arith.constant 11 : i32
    %c0_i32_51 = arith.constant 0 : i32
    %56 = tpu.memref_slice %arg2[%55, %c0_i32_51] : memref<64x16xf32, #tpu.memory_space<any>> -> memref<1x16xf32, #tpu.memory_space<any>>
    %c11_i32_52 = arith.constant 11 : i32
    %c0_i32_53 = arith.constant 0 : i32
    %57 = tpu.memref_slice %arg4[%c11_i32_52, %c0_i32_53] : memref<24x16xf32, #tpu.memory_space<vmem>> -> memref<1x16xf32, #tpu.memory_space<vmem>>
    %58 = tpu.memref_slice %arg5[%c11_i32] : memref<24x!tpu.dma_semaphore, #tpu.memory_space<semaphore_mem>> -> memref<1x!tpu.dma_semaphore, #tpu.memory_space<semaphore_mem>>
    %59 = tpu.memref_squeeze %58 : memref<1x!tpu.dma_semaphore, #tpu.memory_space<semaphore_mem>> -> memref<!tpu.dma_semaphore, #tpu.memory_space<semaphore_mem>>
    tpu.enqueue_dma source(%56 : memref<1x16xf32, #tpu.memory_space<any>>) target(%57 : memref<1x16xf32, #tpu.memory_space<vmem>>) target_semaphore(%59 : memref<!tpu.dma_semaphore, #tpu.memory_space<semaphore_mem>>)
    %c2_54 = arith.constant 2 : index
    %c0_55 = arith.constant 0 : index
    %60 = memref.load %arg1[%c2_54, %c0_55] : memref<4x6xi32, #tpu.memory_space<smem>>
    %c12_i32 = arith.constant 12 : i32
    %c0_i32_56 = arith.constant 0 : i32
    %61 = tpu.memref_slice %arg2[%60, %c0_i32_56] : memref<64x16xf32, #tpu.memory_space<any>> -> memref<1x16xf32, #tpu.memory_space<any>>
    %c12_i32_57 = arith.constant 12 : i32
    %c0_i32_58 = arith.constant 0 : i32
    %62 = tpu.memref_slice %arg4[%c12_i32_57, %c0_i32_58] : memref<24x16xf32, #tpu.memory_space<vmem>> -> memref<1x16xf32, #tpu.memory_space<vmem>>
    %63 = tpu.memref_slice %arg5[%c12_i32] : memref<24x!tpu.dma_semaphore, #tpu.memory_space<semaphore_mem>> -> memref<1x!tpu.dma_semaphore, #tpu.memory_space<semaphore_mem>>
    %64 = tpu.memref_squeeze %63 : memref<1x!tpu.dma_semaphore, #tpu.memory_space<semaphore_mem>> -> memref<!tpu.dma_semaphore, #tpu.memory_space<semaphore_mem>>
    tpu.enqueue_dma source(%61 : memref<1x16xf32, #tpu.memory_space<any>>) target(%62 : memref<1x16xf32, #tpu.memory_space<vmem>>) target_semaphore(%64 : memref<!tpu.dma_semaphore, #tpu.memory_space<semaphore_mem>>)
    %c2_59 = arith.constant 2 : index
    %c1_60 = arith.constant 1 : index
    %65 = memref.load %arg1[%c2_59, %c1_60] : memref<4x6xi32, #tpu.memory_space<smem>>
    %c13_i32 = arith.constant 13 : i32
    %c0_i32_61 = arith.constant 0 : i32
    %66 = tpu.memref_slice %arg2[%65, %c0_i32_61] : memref<64x16xf32, #tpu.memory_space<any>> -> memref<1x16xf32, #tpu.memory_space<any>>
    %c13_i32_62 = arith.constant 13 : i32
    %c0_i32_63 = arith.constant 0 : i32
    %67 = tpu.memref_slice %arg4[%c13_i32_62, %c0_i32_63] : memref<24x16xf32, #tpu.memory_space<vmem>> -> memref<1x16xf32, #tpu.memory_space<vmem>>
    %68 = tpu.memref_slice %arg5[%c13_i32] : memref<24x!tpu.dma_semaphore, #tpu.memory_space<semaphore_mem>> -> memref<1x!tpu.dma_semaphore, #tpu.memory_space<semaphore_mem>>
    %69 = tpu.memref_squeeze %68 : memref<1x!tpu.dma_semaphore, #tpu.memory_space<semaphore_mem>> -> memref<!tpu.dma_semaphore, #tpu.memory_space<semaphore_mem>>
    tpu.enqueue_dma source(%66 : memref<1x16xf32, #tpu.memory_space<any>>) target(%67 : memref<1x16xf32, #tpu.memory_space<vmem>>) target_semaphore(%69 : memref<!tpu.dma_semaphore, #tpu.memory_space<semaphore_mem>>)
    %c2_64 = arith.constant 2 : index
    %c2_65 = arith.constant 2 : index
    %70 = memref.load %arg1[%c2_64, %c2_65] : memref<4x6xi32, #tpu.memory_space<smem>>
    %c14_i32 = arith.constant 14 : i32
    %c0_i32_66 = arith.constant 0 : i32
    %71 = tpu.memref_slice %arg2[%70, %c0_i32_66] : memref<64x16xf32, #tpu.memory_space<any>> -> memref<1x16xf32, #tpu.memory_space<any>>
    %c14_i32_67 = arith.constant 14 : i32
    %c0_i32_68 = arith.constant 0 : i32
    %72 = tpu.memref_slice %arg4[%c14_i32_67, %c0_i32_68] : memref<24x16xf32, #tpu.memory_space<vmem>> -> memref<1x16xf32, #tpu.memory_space<vmem>>
    %73 = tpu.memref_slice %arg5[%c14_i32] : memref<24x!tpu.dma_semaphore, #tpu.memory_space<semaphore_mem>> -> memref<1x!tpu.dma_semaphore, #tpu.memory_space<semaphore_mem>>
    %74 = tpu.memref_squeeze %73 : memref<1x!tpu.dma_semaphore, #tpu.memory_space<semaphore_mem>> -> memref<!tpu.dma_semaphore, #tpu.memory_space<semaphore_mem>>
    tpu.enqueue_dma source(%71 : memref<1x16xf32, #tpu.memory_space<any>>) target(%72 : memref<1x16xf32, #tpu.memory_space<vmem>>) target_semaphore(%74 : memref<!tpu.dma_semaphore, #tpu.memory_space<semaphore_mem>>)
    %c2_69 = arith.constant 2 : index
    %c3_70 = arith.constant 3 : index
    %75 = memref.load %arg1[%c2_69, %c3_70] : memref<4x6xi32, #tpu.memory_space<smem>>
    %c15_i32 = arith.constant 15 : i32
    %c0_i32_71 = arith.constant 0 : i32
    %76 = tpu.memref_slice %arg2[%75, %c0_i32_71] : memref<64x16xf32, #tpu.memory_space<any>> -> memref<1x16xf32, #tpu.memory_space<any>>
    %c15_i32_72 = arith.constant 15 : i32
    %c0_i32_73 = arith.constant 0 : i32
    %77 = tpu.memref_slice %arg4[%c15_i32_72, %c0_i32_73] : memref<24x16xf32, #tpu.memory_space<vmem>> -> memref<1x16xf32, #tpu.memory_space<vmem>>
    %78 = tpu.memref_slice %arg5[%c15_i32] : memref<24x!tpu.dma_semaphore, #tpu.memory_space<semaphore_mem>> -> memref<1x!tpu.dma_semaphore, #tpu.memory_space<semaphore_mem>>
    %79 = tpu.memref_squeeze %78 : memref<1x!tpu.dma_semaphore, #tpu.memory_space<semaphore_mem>> -> memref<!tpu.dma_semaphore, #tpu.memory_space<semaphore_mem>>
    tpu.enqueue_dma source(%76 : memref<1x16xf32, #tpu.memory_space<any>>) target(%77 : memref<1x16xf32, #tpu.memory_space<vmem>>) target_semaphore(%79 : memref<!tpu.dma_semaphore, #tpu.memory_space<semaphore_mem>>)
    %c2_74 = arith.constant 2 : index
    %c4_75 = arith.constant 4 : index
    %80 = memref.load %arg1[%c2_74, %c4_75] : memref<4x6xi32, #tpu.memory_space<smem>>
    %c16_i32 = arith.constant 16 : i32
    %c0_i32_76 = arith.constant 0 : i32
    %81 = tpu.memref_slice %arg2[%80, %c0_i32_76] : memref<64x16xf32, #tpu.memory_space<any>> -> memref<1x16xf32, #tpu.memory_space<any>>
    %c16_i32_77 = arith.constant 16 : i32
    %c0_i32_78 = arith.constant 0 : i32
    %82 = tpu.memref_slice %arg4[%c16_i32_77, %c0_i32_78] : memref<24x16xf32, #tpu.memory_space<vmem>> -> memref<1x16xf32, #tpu.memory_space<vmem>>
    %83 = tpu.memref_slice %arg5[%c16_i32] : memref<24x!tpu.dma_semaphore, #tpu.memory_space<semaphore_mem>> -> memref<1x!tpu.dma_semaphore, #tpu.memory_space<semaphore_mem>>
    %84 = tpu.memref_squeeze %83 : memref<1x!tpu.dma_semaphore, #tpu.memory_space<semaphore_mem>> -> memref<!tpu.dma_semaphore, #tpu.memory_space<semaphore_mem>>
    tpu.enqueue_dma source(%81 : memref<1x16xf32, #tpu.memory_space<any>>) target(%82 : memref<1x16xf32, #tpu.memory_space<vmem>>) target_semaphore(%84 : memref<!tpu.dma_semaphore, #tpu.memory_space<semaphore_mem>>)
    %c2_79 = arith.constant 2 : index
    %c5_80 = arith.constant 5 : index
    %85 = memref.load %arg1[%c2_79, %c5_80] : memref<4x6xi32, #tpu.memory_space<smem>>
    %c17_i32 = arith.constant 17 : i32
    %c0_i32_81 = arith.constant 0 : i32
    %86 = tpu.memref_slice %arg2[%85, %c0_i32_81] : memref<64x16xf32, #tpu.memory_space<any>> -> memref<1x16xf32, #tpu.memory_space<any>>
    %c17_i32_82 = arith.constant 17 : i32
    %c0_i32_83 = arith.constant 0 : i32
    %87 = tpu.memref_slice %arg4[%c17_i32_82, %c0_i32_83] : memref<24x16xf32, #tpu.memory_space<vmem>> -> memref<1x16xf32, #tpu.memory_space<vmem>>
    %88 = tpu.memref_slice %arg5[%c17_i32] : memref<24x!tpu.dma_semaphore, #tpu.memory_space<semaphore_mem>> -> memref<1x!tpu.dma_semaphore, #tpu.memory_space<semaphore_mem>>
    %89 = tpu.memref_squeeze %88 : memref<1x!tpu.dma_semaphore, #tpu.memory_space<semaphore_mem>> -> memref<!tpu.dma_semaphore, #tpu.memory_space<semaphore_mem>>
    tpu.enqueue_dma source(%86 : memref<1x16xf32, #tpu.memory_space<any>>) target(%87 : memref<1x16xf32, #tpu.memory_space<vmem>>) target_semaphore(%89 : memref<!tpu.dma_semaphore, #tpu.memory_space<semaphore_mem>>)
    %c3_84 = arith.constant 3 : index
    %c0_85 = arith.constant 0 : index
    %90 = memref.load %arg1[%c3_84, %c0_85] : memref<4x6xi32, #tpu.memory_space<smem>>
    %c18_i32 = arith.constant 18 : i32
    %c0_i32_86 = arith.constant 0 : i32
    %91 = tpu.memref_slice %arg2[%90, %c0_i32_86] : memref<64x16xf32, #tpu.memory_space<any>> -> memref<1x16xf32, #tpu.memory_space<any>>
    %c18_i32_87 = arith.constant 18 : i32
    %c0_i32_88 = arith.constant 0 : i32
    %92 = tpu.memref_slice %arg4[%c18_i32_87, %c0_i32_88] : memref<24x16xf32, #tpu.memory_space<vmem>> -> memref<1x16xf32, #tpu.memory_space<vmem>>
    %93 = tpu.memref_slice %arg5[%c18_i32] : memref<24x!tpu.dma_semaphore, #tpu.memory_space<semaphore_mem>> -> memref<1x!tpu.dma_semaphore, #tpu.memory_space<semaphore_mem>>
    %94 = tpu.memref_squeeze %93 : memref<1x!tpu.dma_semaphore, #tpu.memory_space<semaphore_mem>> -> memref<!tpu.dma_semaphore, #tpu.memory_space<semaphore_mem>>
    tpu.enqueue_dma source(%91 : memref<1x16xf32, #tpu.memory_space<any>>) target(%92 : memref<1x16xf32, #tpu.memory_space<vmem>>) target_semaphore(%94 : memref<!tpu.dma_semaphore, #tpu.memory_space<semaphore_mem>>)
    %c3_89 = arith.constant 3 : index
    %c1_90 = arith.constant 1 : index
    %95 = memref.load %arg1[%c3_89, %c1_90] : memref<4x6xi32, #tpu.memory_space<smem>>
    %c19_i32 = arith.constant 19 : i32
    %c0_i32_91 = arith.constant 0 : i32
    %96 = tpu.memref_slice %arg2[%95, %c0_i32_91] : memref<64x16xf32, #tpu.memory_space<any>> -> memref<1x16xf32, #tpu.memory_space<any>>
    %c19_i32_92 = arith.constant 19 : i32
    %c0_i32_93 = arith.constant 0 : i32
    %97 = tpu.memref_slice %arg4[%c19_i32_92, %c0_i32_93] : memref<24x16xf32, #tpu.memory_space<vmem>> -> memref<1x16xf32, #tpu.memory_space<vmem>>
    %98 = tpu.memref_slice %arg5[%c19_i32] : memref<24x!tpu.dma_semaphore, #tpu.memory_space<semaphore_mem>> -> memref<1x!tpu.dma_semaphore, #tpu.memory_space<semaphore_mem>>
    %99 = tpu.memref_squeeze %98 : memref<1x!tpu.dma_semaphore, #tpu.memory_space<semaphore_mem>> -> memref<!tpu.dma_semaphore, #tpu.memory_space<semaphore_mem>>
    tpu.enqueue_dma source(%96 : memref<1x16xf32, #tpu.memory_space<any>>) target(%97 : memref<1x16xf32, #tpu.memory_space<vmem>>) target_semaphore(%99 : memref<!tpu.dma_semaphore, #tpu.memory_space<semaphore_mem>>)
    %c3_94 = arith.constant 3 : index
    %c2_95 = arith.constant 2 : index
    %100 = memref.load %arg1[%c3_94, %c2_95] : memref<4x6xi32, #tpu.memory_space<smem>>
    %c20_i32 = arith.constant 20 : i32
    %c0_i32_96 = arith.constant 0 : i32
    %101 = tpu.memref_slice %arg2[%100, %c0_i32_96] : memref<64x16xf32, #tpu.memory_space<any>> -> memref<1x16xf32, #tpu.memory_space<any>>
    %c20_i32_97 = arith.constant 20 : i32
    %c0_i32_98 = arith.constant 0 : i32
    %102 = tpu.memref_slice %arg4[%c20_i32_97, %c0_i32_98] : memref<24x16xf32, #tpu.memory_space<vmem>> -> memref<1x16xf32, #tpu.memory_space<vmem>>
    %103 = tpu.memref_slice %arg5[%c20_i32] : memref<24x!tpu.dma_semaphore, #tpu.memory_space<semaphore_mem>> -> memref<1x!tpu.dma_semaphore, #tpu.memory_space<semaphore_mem>>
    %104 = tpu.memref_squeeze %103 : memref<1x!tpu.dma_semaphore, #tpu.memory_space<semaphore_mem>> -> memref<!tpu.dma_semaphore, #tpu.memory_space<semaphore_mem>>
    tpu.enqueue_dma source(%101 : memref<1x16xf32, #tpu.memory_space<any>>) target(%102 : memref<1x16xf32, #tpu.memory_space<vmem>>) target_semaphore(%104 : memref<!tpu.dma_semaphore, #tpu.memory_space<semaphore_mem>>)
    %c3_99 = arith.constant 3 : index
    %c3_100 = arith.constant 3 : index
    %105 = memref.load %arg1[%c3_99, %c3_100] : memref<4x6xi32, #tpu.memory_space<smem>>
    %c21_i32 = arith.constant 21 : i32
    %c0_i32_101 = arith.constant 0 : i32
    %106 = tpu.memref_slice %arg2[%105, %c0_i32_101] : memref<64x16xf32, #tpu.memory_space<any>> -> memref<1x16xf32, #tpu.memory_space<any>>
    %c21_i32_102 = arith.constant 21 : i32
    %c0_i32_103 = arith.constant 0 : i32
    %107 = tpu.memref_slice %arg4[%c21_i32_102, %c0_i32_103] : memref<24x16xf32, #tpu.memory_space<vmem>> -> memref<1x16xf32, #tpu.memory_space<vmem>>
    %108 = tpu.memref_slice %arg5[%c21_i32] : memref<24x!tpu.dma_semaphore, #tpu.memory_space<semaphore_mem>> -> memref<1x!tpu.dma_semaphore, #tpu.memory_space<semaphore_mem>>
    %109 = tpu.memref_squeeze %108 : memref<1x!tpu.dma_semaphore, #tpu.memory_space<semaphore_mem>> -> memref<!tpu.dma_semaphore, #tpu.memory_space<semaphore_mem>>
    tpu.enqueue_dma source(%106 : memref<1x16xf32, #tpu.memory_space<any>>) target(%107 : memref<1x16xf32, #tpu.memory_space<vmem>>) target_semaphore(%109 : memref<!tpu.dma_semaphore, #tpu.memory_space<semaphore_mem>>)
    %c3_104 = arith.constant 3 : index
    %c4_105 = arith.constant 4 : index
    %110 = memref.load %arg1[%c3_104, %c4_105] : memref<4x6xi32, #tpu.memory_space<smem>>
    %c22_i32 = arith.constant 22 : i32
    %c0_i32_106 = arith.constant 0 : i32
    %111 = tpu.memref_slice %arg2[%110, %c0_i32_106] : memref<64x16xf32, #tpu.memory_space<any>> -> memref<1x16xf32, #tpu.memory_space<any>>
    %c22_i32_107 = arith.constant 22 : i32
    %c0_i32_108 = arith.constant 0 : i32
    %112 = tpu.memref_slice %arg4[%c22_i32_107, %c0_i32_108] : memref<24x16xf32, #tpu.memory_space<vmem>> -> memref<1x16xf32, #tpu.memory_space<vmem>>
    %113 = tpu.memref_slice %arg5[%c22_i32] : memref<24x!tpu.dma_semaphore, #tpu.memory_space<semaphore_mem>> -> memref<1x!tpu.dma_semaphore, #tpu.memory_space<semaphore_mem>>
    %114 = tpu.memref_squeeze %113 : memref<1x!tpu.dma_semaphore, #tpu.memory_space<semaphore_mem>> -> memref<!tpu.dma_semaphore, #tpu.memory_space<semaphore_mem>>
    tpu.enqueue_dma source(%111 : memref<1x16xf32, #tpu.memory_space<any>>) target(%112 : memref<1x16xf32, #tpu.memory_space<vmem>>) target_semaphore(%114 : memref<!tpu.dma_semaphore, #tpu.memory_space<semaphore_mem>>)
    %c3_109 = arith.constant 3 : index
    %c5_110 = arith.constant 5 : index
    %115 = memref.load %arg1[%c3_109, %c5_110] : memref<4x6xi32, #tpu.memory_space<smem>>
    %c23_i32 = arith.constant 23 : i32
    %c0_i32_111 = arith.constant 0 : i32
    %116 = tpu.memref_slice %arg2[%115, %c0_i32_111] : memref<64x16xf32, #tpu.memory_space<any>> -> memref<1x16xf32, #tpu.memory_space<any>>
    %c23_i32_112 = arith.constant 23 : i32
    %c0_i32_113 = arith.constant 0 : i32
    %117 = tpu.memref_slice %arg4[%c23_i32_112, %c0_i32_113] : memref<24x16xf32, #tpu.memory_space<vmem>> -> memref<1x16xf32, #tpu.memory_space<vmem>>
    %118 = tpu.memref_slice %arg5[%c23_i32] : memref<24x!tpu.dma_semaphore, #tpu.memory_space<semaphore_mem>> -> memref<1x!tpu.dma_semaphore, #tpu.memory_space<semaphore_mem>>
    %119 = tpu.memref_squeeze %118 : memref<1x!tpu.dma_semaphore, #tpu.memory_space<semaphore_mem>> -> memref<!tpu.dma_semaphore, #tpu.memory_space<semaphore_mem>>
    tpu.enqueue_dma source(%116 : memref<1x16xf32, #tpu.memory_space<any>>) target(%117 : memref<1x16xf32, #tpu.memory_space<vmem>>) target_semaphore(%119 : memref<!tpu.dma_semaphore, #tpu.memory_space<semaphore_mem>>)
    %c0_i32_114 = arith.constant 0 : i32
    %c0_i32_115 = arith.constant 0 : i32
    %120 = tpu.memref_slice %arg2[%0, %c0_i32_115] : memref<64x16xf32, #tpu.memory_space<any>> -> memref<1x16xf32, #tpu.memory_space<any>>
    %c0_i32_116 = arith.constant 0 : i32
    %c0_i32_117 = arith.constant 0 : i32
    %121 = tpu.memref_slice %arg4[%c0_i32_116, %c0_i32_117] : memref<24x16xf32, #tpu.memory_space<vmem>> -> memref<1x16xf32, #tpu.memory_space<vmem>>
    %122 = tpu.memref_slice %arg5[%c0_i32_114] : memref<24x!tpu.dma_semaphore, #tpu.memory_space<semaphore_mem>> -> memref<1x!tpu.dma_semaphore, #tpu.memory_space<semaphore_mem>>
    %123 = tpu.memref_squeeze %122 : memref<1x!tpu.dma_semaphore, #tpu.memory_space<semaphore_mem>> -> memref<!tpu.dma_semaphore, #tpu.memory_space<semaphore_mem>>
    tpu.wait_dma2 semaphore(%123 : memref<!tpu.dma_semaphore, #tpu.memory_space<semaphore_mem>>) src(%120 : memref<1x16xf32, #tpu.memory_space<any>>) dst(%121 : memref<1x16xf32, #tpu.memory_space<vmem>>)
    %c1_i32_118 = arith.constant 1 : i32
    %c0_i32_119 = arith.constant 0 : i32
    %124 = tpu.memref_slice %arg2[%5, %c0_i32_119] : memref<64x16xf32, #tpu.memory_space<any>> -> memref<1x16xf32, #tpu.memory_space<any>>
    %c1_i32_120 = arith.constant 1 : i32
    %c0_i32_121 = arith.constant 0 : i32
    %125 = tpu.memref_slice %arg4[%c1_i32_120, %c0_i32_121] : memref<24x16xf32, #tpu.memory_space<vmem>> -> memref<1x16xf32, #tpu.memory_space<vmem>>
    %126 = tpu.memref_slice %arg5[%c1_i32_118] : memref<24x!tpu.dma_semaphore, #tpu.memory_space<semaphore_mem>> -> memref<1x!tpu.dma_semaphore, #tpu.memory_space<semaphore_mem>>
    %127 = tpu.memref_squeeze %126 : memref<1x!tpu.dma_semaphore, #tpu.memory_space<semaphore_mem>> -> memref<!tpu.dma_semaphore, #tpu.memory_space<semaphore_mem>>
    tpu.wait_dma2 semaphore(%127 : memref<!tpu.dma_semaphore, #tpu.memory_space<semaphore_mem>>) src(%124 : memref<1x16xf32, #tpu.memory_space<any>>) dst(%125 : memref<1x16xf32, #tpu.memory_space<vmem>>)
    %c2_i32_122 = arith.constant 2 : i32
    %c0_i32_123 = arith.constant 0 : i32
    %128 = tpu.memref_slice %arg2[%10, %c0_i32_123] : memref<64x16xf32, #tpu.memory_space<any>> -> memref<1x16xf32, #tpu.memory_space<any>>
    %c2_i32_124 = arith.constant 2 : i32
    %c0_i32_125 = arith.constant 0 : i32
    %129 = tpu.memref_slice %arg4[%c2_i32_124, %c0_i32_125] : memref<24x16xf32, #tpu.memory_space<vmem>> -> memref<1x16xf32, #tpu.memory_space<vmem>>
    %130 = tpu.memref_slice %arg5[%c2_i32_122] : memref<24x!tpu.dma_semaphore, #tpu.memory_space<semaphore_mem>> -> memref<1x!tpu.dma_semaphore, #tpu.memory_space<semaphore_mem>>
    %131 = tpu.memref_squeeze %130 : memref<1x!tpu.dma_semaphore, #tpu.memory_space<semaphore_mem>> -> memref<!tpu.dma_semaphore, #tpu.memory_space<semaphore_mem>>
    tpu.wait_dma2 semaphore(%131 : memref<!tpu.dma_semaphore, #tpu.memory_space<semaphore_mem>>) src(%128 : memref<1x16xf32, #tpu.memory_space<any>>) dst(%129 : memref<1x16xf32, #tpu.memory_space<vmem>>)
    %c3_i32_126 = arith.constant 3 : i32
    %c0_i32_127 = arith.constant 0 : i32
    %132 = tpu.memref_slice %arg2[%15, %c0_i32_127] : memref<64x16xf32, #tpu.memory_space<any>> -> memref<1x16xf32, #tpu.memory_space<any>>
    %c3_i32_128 = arith.constant 3 : i32
    %c0_i32_129 = arith.constant 0 : i32
    %133 = tpu.memref_slice %arg4[%c3_i32_128, %c0_i32_129] : memref<24x16xf32, #tpu.memory_space<vmem>> -> memref<1x16xf32, #tpu.memory_space<vmem>>
    %134 = tpu.memref_slice %arg5[%c3_i32_126] : memref<24x!tpu.dma_semaphore, #tpu.memory_space<semaphore_mem>> -> memref<1x!tpu.dma_semaphore, #tpu.memory_space<semaphore_mem>>
    %135 = tpu.memref_squeeze %134 : memref<1x!tpu.dma_semaphore, #tpu.memory_space<semaphore_mem>> -> memref<!tpu.dma_semaphore, #tpu.memory_space<semaphore_mem>>
    tpu.wait_dma2 semaphore(%135 : memref<!tpu.dma_semaphore, #tpu.memory_space<semaphore_mem>>) src(%132 : memref<1x16xf32, #tpu.memory_space<any>>) dst(%133 : memref<1x16xf32, #tpu.memory_space<vmem>>)
    %c4_i32_130 = arith.constant 4 : i32
    %c0_i32_131 = arith.constant 0 : i32
    %136 = tpu.memref_slice %arg2[%20, %c0_i32_131] : memref<64x16xf32, #tpu.memory_space<any>> -> memref<1x16xf32, #tpu.memory_space<any>>
    %c4_i32_132 = arith.constant 4 : i32
    %c0_i32_133 = arith.constant 0 : i32
    %137 = tpu.memref_slice %arg4[%c4_i32_132, %c0_i32_133] : memref<24x16xf32, #tpu.memory_space<vmem>> -> memref<1x16xf32, #tpu.memory_space<vmem>>
    %138 = tpu.memref_slice %arg5[%c4_i32_130] : memref<24x!tpu.dma_semaphore, #tpu.memory_space<semaphore_mem>> -> memref<1x!tpu.dma_semaphore, #tpu.memory_space<semaphore_mem>>
    %139 = tpu.memref_squeeze %138 : memref<1x!tpu.dma_semaphore, #tpu.memory_space<semaphore_mem>> -> memref<!tpu.dma_semaphore, #tpu.memory_space<semaphore_mem>>
    tpu.wait_dma2 semaphore(%139 : memref<!tpu.dma_semaphore, #tpu.memory_space<semaphore_mem>>) src(%136 : memref<1x16xf32, #tpu.memory_space<any>>) dst(%137 : memref<1x16xf32, #tpu.memory_space<vmem>>)
    %c5_i32_134 = arith.constant 5 : i32
    %c0_i32_135 = arith.constant 0 : i32
    %140 = tpu.memref_slice %arg2[%25, %c0_i32_135] : memref<64x16xf32, #tpu.memory_space<any>> -> memref<1x16xf32, #tpu.memory_space<any>>
    %c5_i32_136 = arith.constant 5 : i32
    %c0_i32_137 = arith.constant 0 : i32
    %141 = tpu.memref_slice %arg4[%c5_i32_136, %c0_i32_137] : memref<24x16xf32, #tpu.memory_space<vmem>> -> memref<1x16xf32, #tpu.memory_space<vmem>>
    %142 = tpu.memref_slice %arg5[%c5_i32_134] : memref<24x!tpu.dma_semaphore, #tpu.memory_space<semaphore_mem>> -> memref<1x!tpu.dma_semaphore, #tpu.memory_space<semaphore_mem>>
    %143 = tpu.memref_squeeze %142 : memref<1x!tpu.dma_semaphore, #tpu.memory_space<semaphore_mem>> -> memref<!tpu.dma_semaphore, #tpu.memory_space<semaphore_mem>>
    tpu.wait_dma2 semaphore(%143 : memref<!tpu.dma_semaphore, #tpu.memory_space<semaphore_mem>>) src(%140 : memref<1x16xf32, #tpu.memory_space<any>>) dst(%141 : memref<1x16xf32, #tpu.memory_space<vmem>>)
    %c6_i32_138 = arith.constant 6 : i32
    %c0_i32_139 = arith.constant 0 : i32
    %144 = tpu.memref_slice %arg2[%30, %c0_i32_139] : memref<64x16xf32, #tpu.memory_space<any>> -> memref<1x16xf32, #tpu.memory_space<any>>
    %c6_i32_140 = arith.constant 6 : i32
    %c0_i32_141 = arith.constant 0 : i32
    %145 = tpu.memref_slice %arg4[%c6_i32_140, %c0_i32_141] : memref<24x16xf32, #tpu.memory_space<vmem>> -> memref<1x16xf32, #tpu.memory_space<vmem>>
    %146 = tpu.memref_slice %arg5[%c6_i32_138] : memref<24x!tpu.dma_semaphore, #tpu.memory_space<semaphore_mem>> -> memref<1x!tpu.dma_semaphore, #tpu.memory_space<semaphore_mem>>
    %147 = tpu.memref_squeeze %146 : memref<1x!tpu.dma_semaphore, #tpu.memory_space<semaphore_mem>> -> memref<!tpu.dma_semaphore, #tpu.memory_space<semaphore_mem>>
    tpu.wait_dma2 semaphore(%147 : memref<!tpu.dma_semaphore, #tpu.memory_space<semaphore_mem>>) src(%144 : memref<1x16xf32, #tpu.memory_space<any>>) dst(%145 : memref<1x16xf32, #tpu.memory_space<vmem>>)
    %c7_i32_142 = arith.constant 7 : i32
    %c0_i32_143 = arith.constant 0 : i32
    %148 = tpu.memref_slice %arg2[%35, %c0_i32_143] : memref<64x16xf32, #tpu.memory_space<any>> -> memref<1x16xf32, #tpu.memory_space<any>>
    %c7_i32_144 = arith.constant 7 : i32
    %c0_i32_145 = arith.constant 0 : i32
    %149 = tpu.memref_slice %arg4[%c7_i32_144, %c0_i32_145] : memref<24x16xf32, #tpu.memory_space<vmem>> -> memref<1x16xf32, #tpu.memory_space<vmem>>
    %150 = tpu.memref_slice %arg5[%c7_i32_142] : memref<24x!tpu.dma_semaphore, #tpu.memory_space<semaphore_mem>> -> memref<1x!tpu.dma_semaphore, #tpu.memory_space<semaphore_mem>>
    %151 = tpu.memref_squeeze %150 : memref<1x!tpu.dma_semaphore, #tpu.memory_space<semaphore_mem>> -> memref<!tpu.dma_semaphore, #tpu.memory_space<semaphore_mem>>
    tpu.wait_dma2 semaphore(%151 : memref<!tpu.dma_semaphore, #tpu.memory_space<semaphore_mem>>) src(%148 : memref<1x16xf32, #tpu.memory_space<any>>) dst(%149 : memref<1x16xf32, #tpu.memory_space<vmem>>)
    %c8_i32_146 = arith.constant 8 : i32
    %c0_i32_147 = arith.constant 0 : i32
    %152 = tpu.memref_slice %arg2[%40, %c0_i32_147] : memref<64x16xf32, #tpu.memory_space<any>> -> memref<1x16xf32, #tpu.memory_space<any>>
    %c8_i32_148 = arith.constant 8 : i32
    %c0_i32_149 = arith.constant 0 : i32
    %153 = tpu.memref_slice %arg4[%c8_i32_148, %c0_i32_149] : memref<24x16xf32, #tpu.memory_space<vmem>> -> memref<1x16xf32, #tpu.memory_space<vmem>>
    %154 = tpu.memref_slice %arg5[%c8_i32_146] : memref<24x!tpu.dma_semaphore, #tpu.memory_space<semaphore_mem>> -> memref<1x!tpu.dma_semaphore, #tpu.memory_space<semaphore_mem>>
    %155 = tpu.memref_squeeze %154 : memref<1x!tpu.dma_semaphore, #tpu.memory_space<semaphore_mem>> -> memref<!tpu.dma_semaphore, #tpu.memory_space<semaphore_mem>>
    tpu.wait_dma2 semaphore(%155 : memref<!tpu.dma_semaphore, #tpu.memory_space<semaphore_mem>>) src(%152 : memref<1x16xf32, #tpu.memory_space<any>>) dst(%153 : memref<1x16xf32, #tpu.memory_space<vmem>>)
    %c9_i32_150 = arith.constant 9 : i32
    %c0_i32_151 = arith.constant 0 : i32
    %156 = tpu.memref_slice %arg2[%45, %c0_i32_151] : memref<64x16xf32, #tpu.memory_space<any>> -> memref<1x16xf32, #tpu.memory_space<any>>
    %c9_i32_152 = arith.constant 9 : i32
    %c0_i32_153 = arith.constant 0 : i32
    %157 = tpu.memref_slice %arg4[%c9_i32_152, %c0_i32_153] : memref<24x16xf32, #tpu.memory_space<vmem>> -> memref<1x16xf32, #tpu.memory_space<vmem>>
    %158 = tpu.memref_slice %arg5[%c9_i32_150] : memref<24x!tpu.dma_semaphore, #tpu.memory_space<semaphore_mem>> -> memref<1x!tpu.dma_semaphore, #tpu.memory_space<semaphore_mem>>
    %159 = tpu.memref_squeeze %158 : memref<1x!tpu.dma_semaphore, #tpu.memory_space<semaphore_mem>> -> memref<!tpu.dma_semaphore, #tpu.memory_space<semaphore_mem>>
    tpu.wait_dma2 semaphore(%159 : memref<!tpu.dma_semaphore, #tpu.memory_space<semaphore_mem>>) src(%156 : memref<1x16xf32, #tpu.memory_space<any>>) dst(%157 : memref<1x16xf32, #tpu.memory_space<vmem>>)
    %c10_i32_154 = arith.constant 10 : i32
    %c0_i32_155 = arith.constant 0 : i32
    %160 = tpu.memref_slice %arg2[%50, %c0_i32_155] : memref<64x16xf32, #tpu.memory_space<any>> -> memref<1x16xf32, #tpu.memory_space<any>>
    %c10_i32_156 = arith.constant 10 : i32
    %c0_i32_157 = arith.constant 0 : i32
    %161 = tpu.memref_slice %arg4[%c10_i32_156, %c0_i32_157] : memref<24x16xf32, #tpu.memory_space<vmem>> -> memref<1x16xf32, #tpu.memory_space<vmem>>
    %162 = tpu.memref_slice %arg5[%c10_i32_154] : memref<24x!tpu.dma_semaphore, #tpu.memory_space<semaphore_mem>> -> memref<1x!tpu.dma_semaphore, #tpu.memory_space<semaphore_mem>>
    %163 = tpu.memref_squeeze %162 : memref<1x!tpu.dma_semaphore, #tpu.memory_space<semaphore_mem>> -> memref<!tpu.dma_semaphore, #tpu.memory_space<semaphore_mem>>
    tpu.wait_dma2 semaphore(%163 : memref<!tpu.dma_semaphore, #tpu.memory_space<semaphore_mem>>) src(%160 : memref<1x16xf32, #tpu.memory_space<any>>) dst(%161 : memref<1x16xf32, #tpu.memory_space<vmem>>)
    %c11_i32_158 = arith.constant 11 : i32
    %c0_i32_159 = arith.constant 0 : i32
    %164 = tpu.memref_slice %arg2[%55, %c0_i32_159] : memref<64x16xf32, #tpu.memory_space<any>> -> memref<1x16xf32, #tpu.memory_space<any>>
    %c11_i32_160 = arith.constant 11 : i32
    %c0_i32_161 = arith.constant 0 : i32
    %165 = tpu.memref_slice %arg4[%c11_i32_160, %c0_i32_161] : memref<24x16xf32, #tpu.memory_space<vmem>> -> memref<1x16xf32, #tpu.memory_space<vmem>>
    %166 = tpu.memref_slice %arg5[%c11_i32_158] : memref<24x!tpu.dma_semaphore, #tpu.memory_space<semaphore_mem>> -> memref<1x!tpu.dma_semaphore, #tpu.memory_space<semaphore_mem>>
    %167 = tpu.memref_squeeze %166 : memref<1x!tpu.dma_semaphore, #tpu.memory_space<semaphore_mem>> -> memref<!tpu.dma_semaphore, #tpu.memory_space<semaphore_mem>>
    tpu.wait_dma2 semaphore(%167 : memref<!tpu.dma_semaphore, #tpu.memory_space<semaphore_mem>>) src(%164 : memref<1x16xf32, #tpu.memory_space<any>>) dst(%165 : memref<1x16xf32, #tpu.memory_space<vmem>>)
    %c12_i32_162 = arith.constant 12 : i32
    %c0_i32_163 = arith.constant 0 : i32
    %168 = tpu.memref_slice %arg2[%60, %c0_i32_163] : memref<64x16xf32, #tpu.memory_space<any>> -> memref<1x16xf32, #tpu.memory_space<any>>
    %c12_i32_164 = arith.constant 12 : i32
    %c0_i32_165 = arith.constant 0 : i32
    %169 = tpu.memref_slice %arg4[%c12_i32_164, %c0_i32_165] : memref<24x16xf32, #tpu.memory_space<vmem>> -> memref<1x16xf32, #tpu.memory_space<vmem>>
    %170 = tpu.memref_slice %arg5[%c12_i32_162] : memref<24x!tpu.dma_semaphore, #tpu.memory_space<semaphore_mem>> -> memref<1x!tpu.dma_semaphore, #tpu.memory_space<semaphore_mem>>
    %171 = tpu.memref_squeeze %170 : memref<1x!tpu.dma_semaphore, #tpu.memory_space<semaphore_mem>> -> memref<!tpu.dma_semaphore, #tpu.memory_space<semaphore_mem>>
    tpu.wait_dma2 semaphore(%171 : memref<!tpu.dma_semaphore, #tpu.memory_space<semaphore_mem>>) src(%168 : memref<1x16xf32, #tpu.memory_space<any>>) dst(%169 : memref<1x16xf32, #tpu.memory_space<vmem>>)
    %c13_i32_166 = arith.constant 13 : i32
    %c0_i32_167 = arith.constant 0 : i32
    %172 = tpu.memref_slice %arg2[%65, %c0_i32_167] : memref<64x16xf32, #tpu.memory_space<any>> -> memref<1x16xf32, #tpu.memory_space<any>>
    %c13_i32_168 = arith.constant 13 : i32
    %c0_i32_169 = arith.constant 0 : i32
    %173 = tpu.memref_slice %arg4[%c13_i32_168, %c0_i32_169] : memref<24x16xf32, #tpu.memory_space<vmem>> -> memref<1x16xf32, #tpu.memory_space<vmem>>
    %174 = tpu.memref_slice %arg5[%c13_i32_166] : memref<24x!tpu.dma_semaphore, #tpu.memory_space<semaphore_mem>> -> memref<1x!tpu.dma_semaphore, #tpu.memory_space<semaphore_mem>>
    %175 = tpu.memref_squeeze %174 : memref<1x!tpu.dma_semaphore, #tpu.memory_space<semaphore_mem>> -> memref<!tpu.dma_semaphore, #tpu.memory_space<semaphore_mem>>
    tpu.wait_dma2 semaphore(%175 : memref<!tpu.dma_semaphore, #tpu.memory_space<semaphore_mem>>) src(%172 : memref<1x16xf32, #tpu.memory_space<any>>) dst(%173 : memref<1x16xf32, #tpu.memory_space<vmem>>)
    %c14_i32_170 = arith.constant 14 : i32
    %c0_i32_171 = arith.constant 0 : i32
    %176 = tpu.memref_slice %arg2[%70, %c0_i32_171] : memref<64x16xf32, #tpu.memory_space<any>> -> memref<1x16xf32, #tpu.memory_space<any>>
    %c14_i32_172 = arith.constant 14 : i32
    %c0_i32_173 = arith.constant 0 : i32
    %177 = tpu.memref_slice %arg4[%c14_i32_172, %c0_i32_173] : memref<24x16xf32, #tpu.memory_space<vmem>> -> memref<1x16xf32, #tpu.memory_space<vmem>>
    %178 = tpu.memref_slice %arg5[%c14_i32_170] : memref<24x!tpu.dma_semaphore, #tpu.memory_space<semaphore_mem>> -> memref<1x!tpu.dma_semaphore, #tpu.memory_space<semaphore_mem>>
    %179 = tpu.memref_squeeze %178 : memref<1x!tpu.dma_semaphore, #tpu.memory_space<semaphore_mem>> -> memref<!tpu.dma_semaphore, #tpu.memory_space<semaphore_mem>>
    tpu.wait_dma2 semaphore(%179 : memref<!tpu.dma_semaphore, #tpu.memory_space<semaphore_mem>>) src(%176 : memref<1x16xf32, #tpu.memory_space<any>>) dst(%177 : memref<1x16xf32, #tpu.memory_space<vmem>>)
    %c15_i32_174 = arith.constant 15 : i32
    %c0_i32_175 = arith.constant 0 : i32
    %180 = tpu.memref_slice %arg2[%75, %c0_i32_175] : memref<64x16xf32, #tpu.memory_space<any>> -> memref<1x16xf32, #tpu.memory_space<any>>
    %c15_i32_176 = arith.constant 15 : i32
    %c0_i32_177 = arith.constant 0 : i32
    %181 = tpu.memref_slice %arg4[%c15_i32_176, %c0_i32_177] : memref<24x16xf32, #tpu.memory_space<vmem>> -> memref<1x16xf32, #tpu.memory_space<vmem>>
    %182 = tpu.memref_slice %arg5[%c15_i32_174] : memref<24x!tpu.dma_semaphore, #tpu.memory_space<semaphore_mem>> -> memref<1x!tpu.dma_semaphore, #tpu.memory_space<semaphore_mem>>
    %183 = tpu.memref_squeeze %182 : memref<1x!tpu.dma_semaphore, #tpu.memory_space<semaphore_mem>> -> memref<!tpu.dma_semaphore, #tpu.memory_space<semaphore_mem>>
    tpu.wait_dma2 semaphore(%183 : memref<!tpu.dma_semaphore, #tpu.memory_space<semaphore_mem>>) src(%180 : memref<1x16xf32, #tpu.memory_space<any>>) dst(%181 : memref<1x16xf32, #tpu.memory_space<vmem>>)
    %c16_i32_178 = arith.constant 16 : i32
    %c0_i32_179 = arith.constant 0 : i32
    %184 = tpu.memref_slice %arg2[%80, %c0_i32_179] : memref<64x16xf32, #tpu.memory_space<any>> -> memref<1x16xf32, #tpu.memory_space<any>>
    %c16_i32_180 = arith.constant 16 : i32
    %c0_i32_181 = arith.constant 0 : i32
    %185 = tpu.memref_slice %arg4[%c16_i32_180, %c0_i32_181] : memref<24x16xf32, #tpu.memory_space<vmem>> -> memref<1x16xf32, #tpu.memory_space<vmem>>
    %186 = tpu.memref_slice %arg5[%c16_i32_178] : memref<24x!tpu.dma_semaphore, #tpu.memory_space<semaphore_mem>> -> memref<1x!tpu.dma_semaphore, #tpu.memory_space<semaphore_mem>>
    %187 = tpu.memref_squeeze %186 : memref<1x!tpu.dma_semaphore, #tpu.memory_space<semaphore_mem>> -> memref<!tpu.dma_semaphore, #tpu.memory_space<semaphore_mem>>
    tpu.wait_dma2 semaphore(%187 : memref<!tpu.dma_semaphore, #tpu.memory_space<semaphore_mem>>) src(%184 : memref<1x16xf32, #tpu.memory_space<any>>) dst(%185 : memref<1x16xf32, #tpu.memory_space<vmem>>)
    %c17_i32_182 = arith.constant 17 : i32
    %c0_i32_183 = arith.constant 0 : i32
    %188 = tpu.memref_slice %arg2[%85, %c0_i32_183] : memref<64x16xf32, #tpu.memory_space<any>> -> memref<1x16xf32, #tpu.memory_space<any>>
    %c17_i32_184 = arith.constant 17 : i32
    %c0_i32_185 = arith.constant 0 : i32
    %189 = tpu.memref_slice %arg4[%c17_i32_184, %c0_i32_185] : memref<24x16xf32, #tpu.memory_space<vmem>> -> memref<1x16xf32, #tpu.memory_space<vmem>>
    %190 = tpu.memref_slice %arg5[%c17_i32_182] : memref<24x!tpu.dma_semaphore, #tpu.memory_space<semaphore_mem>> -> memref<1x!tpu.dma_semaphore, #tpu.memory_space<semaphore_mem>>
    %191 = tpu.memref_squeeze %190 : memref<1x!tpu.dma_semaphore, #tpu.memory_space<semaphore_mem>> -> memref<!tpu.dma_semaphore, #tpu.memory_space<semaphore_mem>>
    tpu.wait_dma2 semaphore(%191 : memref<!tpu.dma_semaphore, #tpu.memory_space<semaphore_mem>>) src(%188 : memref<1x16xf32, #tpu.memory_space<any>>) dst(%189 : memref<1x16xf32, #tpu.memory_space<vmem>>)
    %c18_i32_186 = arith.constant 18 : i32
    %c0_i32_187 = arith.constant 0 : i32
    %192 = tpu.memref_slice %arg2[%90, %c0_i32_187] : memref<64x16xf32, #tpu.memory_space<any>> -> memref<1x16xf32, #tpu.memory_space<any>>
    %c18_i32_188 = arith.constant 18 : i32
    %c0_i32_189 = arith.constant 0 : i32
    %193 = tpu.memref_slice %arg4[%c18_i32_188, %c0_i32_189] : memref<24x16xf32, #tpu.memory_space<vmem>> -> memref<1x16xf32, #tpu.memory_space<vmem>>
    %194 = tpu.memref_slice %arg5[%c18_i32_186] : memref<24x!tpu.dma_semaphore, #tpu.memory_space<semaphore_mem>> -> memref<1x!tpu.dma_semaphore, #tpu.memory_space<semaphore_mem>>
    %195 = tpu.memref_squeeze %194 : memref<1x!tpu.dma_semaphore, #tpu.memory_space<semaphore_mem>> -> memref<!tpu.dma_semaphore, #tpu.memory_space<semaphore_mem>>
    tpu.wait_dma2 semaphore(%195 : memref<!tpu.dma_semaphore, #tpu.memory_space<semaphore_mem>>) src(%192 : memref<1x16xf32, #tpu.memory_space<any>>) dst(%193 : memref<1x16xf32, #tpu.memory_space<vmem>>)
    %c19_i32_190 = arith.constant 19 : i32
    %c0_i32_191 = arith.constant 0 : i32
    %196 = tpu.memref_slice %arg2[%95, %c0_i32_191] : memref<64x16xf32, #tpu.memory_space<any>> -> memref<1x16xf32, #tpu.memory_space<any>>
    %c19_i32_192 = arith.constant 19 : i32
    %c0_i32_193 = arith.constant 0 : i32
    %197 = tpu.memref_slice %arg4[%c19_i32_192, %c0_i32_193] : memref<24x16xf32, #tpu.memory_space<vmem>> -> memref<1x16xf32, #tpu.memory_space<vmem>>
    %198 = tpu.memref_slice %arg5[%c19_i32_190] : memref<24x!tpu.dma_semaphore, #tpu.memory_space<semaphore_mem>> -> memref<1x!tpu.dma_semaphore, #tpu.memory_space<semaphore_mem>>
    %199 = tpu.memref_squeeze %198 : memref<1x!tpu.dma_semaphore, #tpu.memory_space<semaphore_mem>> -> memref<!tpu.dma_semaphore, #tpu.memory_space<semaphore_mem>>
    tpu.wait_dma2 semaphore(%199 : memref<!tpu.dma_semaphore, #tpu.memory_space<semaphore_mem>>) src(%196 : memref<1x16xf32, #tpu.memory_space<any>>) dst(%197 : memref<1x16xf32, #tpu.memory_space<vmem>>)
    %c20_i32_194 = arith.constant 20 : i32
    %c0_i32_195 = arith.constant 0 : i32
    %200 = tpu.memref_slice %arg2[%100, %c0_i32_195] : memref<64x16xf32, #tpu.memory_space<any>> -> memref<1x16xf32, #tpu.memory_space<any>>
    %c20_i32_196 = arith.constant 20 : i32
    %c0_i32_197 = arith.constant 0 : i32
    %201 = tpu.memref_slice %arg4[%c20_i32_196, %c0_i32_197] : memref<24x16xf32, #tpu.memory_space<vmem>> -> memref<1x16xf32, #tpu.memory_space<vmem>>
    %202 = tpu.memref_slice %arg5[%c20_i32_194] : memref<24x!tpu.dma_semaphore, #tpu.memory_space<semaphore_mem>> -> memref<1x!tpu.dma_semaphore, #tpu.memory_space<semaphore_mem>>
    %203 = tpu.memref_squeeze %202 : memref<1x!tpu.dma_semaphore, #tpu.memory_space<semaphore_mem>> -> memref<!tpu.dma_semaphore, #tpu.memory_space<semaphore_mem>>
    tpu.wait_dma2 semaphore(%203 : memref<!tpu.dma_semaphore, #tpu.memory_space<semaphore_mem>>) src(%200 : memref<1x16xf32, #tpu.memory_space<any>>) dst(%201 : memref<1x16xf32, #tpu.memory_space<vmem>>)
    %c21_i32_198 = arith.constant 21 : i32
    %c0_i32_199 = arith.constant 0 : i32
    %204 = tpu.memref_slice %arg2[%105, %c0_i32_199] : memref<64x16xf32, #tpu.memory_space<any>> -> memref<1x16xf32, #tpu.memory_space<any>>
    %c21_i32_200 = arith.constant 21 : i32
    %c0_i32_201 = arith.constant 0 : i32
    %205 = tpu.memref_slice %arg4[%c21_i32_200, %c0_i32_201] : memref<24x16xf32, #tpu.memory_space<vmem>> -> memref<1x16xf32, #tpu.memory_space<vmem>>
    %206 = tpu.memref_slice %arg5[%c21_i32_198] : memref<24x!tpu.dma_semaphore, #tpu.memory_space<semaphore_mem>> -> memref<1x!tpu.dma_semaphore, #tpu.memory_space<semaphore_mem>>
    %207 = tpu.memref_squeeze %206 : memref<1x!tpu.dma_semaphore, #tpu.memory_space<semaphore_mem>> -> memref<!tpu.dma_semaphore, #tpu.memory_space<semaphore_mem>>
    tpu.wait_dma2 semaphore(%207 : memref<!tpu.dma_semaphore, #tpu.memory_space<semaphore_mem>>) src(%204 : memref<1x16xf32, #tpu.memory_space<any>>) dst(%205 : memref<1x16xf32, #tpu.memory_space<vmem>>)
    %c22_i32_202 = arith.constant 22 : i32
    %c0_i32_203 = arith.constant 0 : i32
    %208 = tpu.memref_slice %arg2[%110, %c0_i32_203] : memref<64x16xf32, #tpu.memory_space<any>> -> memref<1x16xf32, #tpu.memory_space<any>>
    %c22_i32_204 = arith.constant 22 : i32
    %c0_i32_205 = arith.constant 0 : i32
    %209 = tpu.memref_slice %arg4[%c22_i32_204, %c0_i32_205] : memref<24x16xf32, #tpu.memory_space<vmem>> -> memref<1x16xf32, #tpu.memory_space<vmem>>
    %210 = tpu.memref_slice %arg5[%c22_i32_202] : memref<24x!tpu.dma_semaphore, #tpu.memory_space<semaphore_mem>> -> memref<1x!tpu.dma_semaphore, #tpu.memory_space<semaphore_mem>>
    %211 = tpu.memref_squeeze %210 : memref<1x!tpu.dma_semaphore, #tpu.memory_space<semaphore_mem>> -> memref<!tpu.dma_semaphore, #tpu.memory_space<semaphore_mem>>
    tpu.wait_dma2 semaphore(%211 : memref<!tpu.dma_semaphore, #tpu.memory_space<semaphore_mem>>) src(%208 : memref<1x16xf32, #tpu.memory_space<any>>) dst(%209 : memref<1x16xf32, #tpu.memory_space<vmem>>)
    %c23_i32_206 = arith.constant 23 : i32
    %c0_i32_207 = arith.constant 0 : i32
    %212 = tpu.memref_slice %arg2[%115, %c0_i32_207] : memref<64x16xf32, #tpu.memory_space<any>> -> memref<1x16xf32, #tpu.memory_space<any>>
    %c23_i32_208 = arith.constant 23 : i32
    %c0_i32_209 = arith.constant 0 : i32
    %213 = tpu.memref_slice %arg4[%c23_i32_208, %c0_i32_209] : memref<24x16xf32, #tpu.memory_space<vmem>> -> memref<1x16xf32, #tpu.memory_space<vmem>>
    %214 = tpu.memref_slice %arg5[%c23_i32_206] : memref<24x!tpu.dma_semaphore, #tpu.memory_space<semaphore_mem>> -> memref<1x!tpu.dma_semaphore, #tpu.memory_space<semaphore_mem>>
    %215 = tpu.memref_squeeze %214 : memref<1x!tpu.dma_semaphore, #tpu.memory_space<semaphore_mem>> -> memref<!tpu.dma_semaphore, #tpu.memory_space<semaphore_mem>>
    tpu.wait_dma2 semaphore(%215 : memref<!tpu.dma_semaphore, #tpu.memory_space<semaphore_mem>>) src(%212 : memref<1x16xf32, #tpu.memory_space<any>>) dst(%213 : memref<1x16xf32, #tpu.memory_space<vmem>>)
    %c0_210 = arith.constant 0 : index
    %c0_211 = arith.constant 0 : index
    %216 = vector.load %arg4[%c0_210, %c0_211] : memref<24x16xf32, #tpu.memory_space<vmem>>, vector<24x16xf32>
    %217 = arith.mulf %216, %216 : vector<24x16xf32>
    %cst = arith.constant dense<0.000000e+00> : vector<24xf32>
    %218 = vector.multi_reduction <add>, %217, %cst [1] : vector<24x16xf32> to vector<24xf32>
    %219 = vector.shape_cast %218 : vector<24xf32> to vector<24x1xf32>
    %220 = math.sqrt %219 : vector<24x1xf32>
    %cst_212 = arith.constant 1.000000e+00 : f32
    %221 = vector.broadcast %cst_212 : f32 to vector<24x1xf32>
    %222 = arith.cmpf ogt, %220, %221 : vector<24x1xf32>
    %cst_213 = arith.constant 1.000000e-07 : f32
    %223 = vector.broadcast %cst_213 : f32 to vector<24x1xf32>
    %224 = arith.addf %220, %223 : vector<24x1xf32>
    %cst_214 = arith.constant 1.000000e+00 : f32
    %225 = vector.broadcast %cst_214 : f32 to vector<24x1xf32>
    %226 = arith.divf %225, %224 : vector<24x1xf32>
    %cst_215 = arith.constant 1.000000e+00 : f32
    %227 = vector.broadcast %cst_215 : f32 to vector<24x1xf32>
    %228 = arith.select %222, %226, %227 : vector<24x1xi1>, vector<24x1xf32>
    %229 = vector.broadcast %228 : vector<24x1xf32> to vector<24x16xf32>
    %230 = arith.mulf %216, %229 : vector<24x16xf32>
    %231 = vector.extract_strided_slice %230 {offsets = [0, 0], sizes = [6, 16], strides = [1, 1]} : vector<24x16xf32> to vector<6x16xf32>
    %cst_216 = arith.constant dense<0.000000e+00> : vector<16xf32>
    %232 = vector.multi_reduction <add>, %231, %cst_216 [0] : vector<6x16xf32> to vector<16xf32>
    %233 = vector.shape_cast %232 : vector<16xf32> to vector<1x16xf32>
    %cst_217 = arith.constant 0.166666672 : f32
    %234 = vector.broadcast %cst_217 : f32 to vector<1x16xf32>
    %235 = arith.mulf %233, %234 : vector<1x16xf32>
    %c0_218 = arith.constant 0 : index
    %c0_219 = arith.constant 0 : index
    %236 = vector.load %arg3[%c0_218, %c0_219] : memref<8x16xf32, #tpu.memory_space<vmem>>, vector<1x16xf32>
    tpu.vector_store %arg3[%c0_218, %c0_219], %235 {strides = array<i32>} : memref<8x16xf32, #tpu.memory_space<vmem>>, vector<1x16xf32>,
    %237 = vector.extract_strided_slice %230 {offsets = [6, 0], sizes = [6, 16], strides = [1, 1]} : vector<24x16xf32> to vector<6x16xf32>
    %cst_220 = arith.constant dense<0.000000e+00> : vector<16xf32>
    %238 = vector.multi_reduction <add>, %237, %cst_220 [0] : vector<6x16xf32> to vector<16xf32>
    %239 = vector.shape_cast %238 : vector<16xf32> to vector<1x16xf32>
    %cst_221 = arith.constant 0.166666672 : f32
    %240 = vector.broadcast %cst_221 : f32 to vector<1x16xf32>
    %241 = arith.mulf %239, %240 : vector<1x16xf32>
    %c1_222 = arith.constant 1 : index
    %c0_223 = arith.constant 0 : index
    %242 = vector.load %arg3[%c1_222, %c0_223] : memref<8x16xf32, #tpu.memory_space<vmem>>, vector<1x16xf32>
    tpu.vector_store %arg3[%c1_222, %c0_223], %241 {strides = array<i32>} : memref<8x16xf32, #tpu.memory_space<vmem>>, vector<1x16xf32>,
    %243 = vector.extract_strided_slice %230 {offsets = [12, 0], sizes = [6, 16], strides = [1, 1]} : vector<24x16xf32> to vector<6x16xf32>
    %cst_224 = arith.constant dense<0.000000e+00> : vector<16xf32>
    %244 = vector.multi_reduction <add>, %243, %cst_224 [0] : vector<6x16xf32> to vector<16xf32>
    %245 = vector.shape_cast %244 : vector<16xf32> to vector<1x16xf32>
    %cst_225 = arith.constant 0.166666672 : f32
    %246 = vector.broadcast %cst_225 : f32 to vector<1x16xf32>
    %247 = arith.mulf %245, %246 : vector<1x16xf32>
    %c2_226 = arith.constant 2 : index
    %c0_227 = arith.constant 0 : index
    %248 = vector.load %arg3[%c2_226, %c0_227] : memref<8x16xf32, #tpu.memory_space<vmem>>, vector<1x16xf32>
    tpu.vector_store %arg3[%c2_226, %c0_227], %247 {strides = array<i32>} : memref<8x16xf32, #tpu.memory_space<vmem>>, vector<1x16xf32>,
    %249 = vector.extract_strided_slice %230 {offsets = [18, 0], sizes = [6, 16], strides = [1, 1]} : vector<24x16xf32> to vector<6x16xf32>
    %cst_228 = arith.constant dense<0.000000e+00> : vector<16xf32>
    %250 = vector.multi_reduction <add>, %249, %cst_228 [0] : vector<6x16xf32> to vector<16xf32>
    %251 = vector.shape_cast %250 : vector<16xf32> to vector<1x16xf32>
    %cst_229 = arith.constant 0.166666672 : f32
    %252 = vector.broadcast %cst_229 : f32 to vector<1x16xf32>
    %253 = arith.mulf %251, %252 : vector<1x16xf32>
    %c3_230 = arith.constant 3 : index
    %c0_231 = arith.constant 0 : index
    %254 = vector.load %arg3[%c3_230, %c0_231] : memref<8x16xf32, #tpu.memory_space<vmem>>, vector<1x16xf32>
    tpu.vector_store %arg3[%c3_230, %c0_231], %253 {strides = array<i32>} : memref<8x16xf32, #tpu.memory_space<vmem>>, vector<1x16xf32>,
    %cst_232 = arith.constant 0.000000e+00 : f32
    %255 = vector.broadcast %cst_232 : f32 to vector<1x16xf32>
    %c4_233 = arith.constant 4 : index
    %c0_234 = arith.constant 0 : index
    %256 = vector.load %arg3[%c4_233, %c0_234] : memref<8x16xf32, #tpu.memory_space<vmem>>, vector<1x16xf32>
    tpu.vector_store %arg3[%c4_233, %c0_234], %255 {strides = array<i32>} : memref<8x16xf32, #tpu.memory_space<vmem>>, vector<1x16xf32>,
    %cst_235 = arith.constant 0.000000e+00 : f32
    %257 = vector.broadcast %cst_235 : f32 to vector<1x16xf32>
    %c5_236 = arith.constant 5 : index
    %c0_237 = arith.constant 0 : index
    %258 = vector.load %arg3[%c5_236, %c0_237] : memref<8x16xf32, #tpu.memory_space<vmem>>, vector<1x16xf32>
    tpu.vector_store %arg3[%c5_236, %c0_237], %257 {strides = array<i32>} : memref<8x16xf32, #tpu.memory_space<vmem>>, vector<1x16xf32>,
    %cst_238 = arith.constant 0.000000e+00 : f32
    %259 = vector.broadcast %cst_238 : f32 to vector<1x16xf32>
    %c6 = arith.constant 6 : index
    %c0_239 = arith.constant 0 : index
    %260 = vector.load %arg3[%c6, %c0_239] : memref<8x16xf32, #tpu.memory_space<vmem>>, vector<1x16xf32>
    tpu.vector_store %arg3[%c6, %c0_239], %259 {strides = array<i32>} : memref<8x16xf32, #tpu.memory_space<vmem>>, vector<1x16xf32>,
    %cst_240 = arith.constant 0.000000e+00 : f32
    %261 = vector.broadcast %cst_240 : f32 to vector<1x16xf32>
    %c7 = arith.constant 7 : index
    %c0_241 = arith.constant 0 : index
    %262 = vector.load %arg3[%c7, %c0_241] : memref<8x16xf32, #tpu.memory_space<vmem>>, vector<1x16xf32>
    tpu.vector_store %arg3[%c7, %c0_241], %261 {strides = array<i32>} : memref<8x16xf32, #tpu.memory_space<vmem>>, vector<1x16xf32>,
    return
  }
  func.func @transform_1(%arg0: i32, %arg1: memref<4x6xi32, #tpu.memory_space<smem>>) -> (i32, i32) {
    %c0_i32 = arith.constant 0 : i32
    %c0_i32_0 = arith.constant 0 : i32
    %c0_i32_1 = arith.constant 0 : i32
    return %c0_i32, %c0_i32_0 : i32, i32
  }
}

</mosaic_0001>

<bundles_post_ra>
// kernel: cbow_forward.3
= control target key start
LH: loop header
LB: loop body
LE: loop exit
PB: predicated region body
PF: predicated region fallthrough
CT: control target
= control target key end

     0   :  { %vm29_vm0 = vcmask 130048   ;;  %s90_s1 = inlined_call_operand.vmem [shape: bf16[16,128], index: 1, kind: input, shape index: {}]   ;;  %s91_s0 = inlined_call_operand.vmem [shape: f32[8,16], index: 0, kind: input, shape index: {}]   ;;  %s92_s2 = inlined_call_operand.vmem [shape: f32[1,128], index: 2, kind: input, shape index: {}]   ;;  %s93_s3 = inlined_call_operand.vmem [shape: f32[8,128], index: 3, kind: output, shape index: {}]  }
   0x1   :  { %v56_v0 = vld [vmem:[%s90_s1] sm:$0xff] }
   0x2   :  { %v15_v1 = vld [vmem:[%s91_s0] sm:$0xff]  ;;  %40 = vmatpush.bf16.msra.mxu0 %v56_v0 }
   0x3   :  { %v16_v2 = vpack.c.bf16 %v15_v1, %v15_v1  ;;  %v57_v3 = vld [vmem:[%s92_s2] ss:$0 sm:$0xff] }
   0x5   :  { %55 = vmatmul.msk.bf16.vlgmr.msra.gmra.mxu0 %vm29_vm0, %v16_v2 }
  0x82   :  { %v42_v4 = vpop.f32.mrf.mxu0 }
  0x83   :  { %v43_v5 = vadd.f32 %v57_v3, %v42_v4 }
  0x85   :  { %46 = vst [vmem:[%s93_s3] sm:$0xff] %v43_v5 }
  0x8a   :  { %v44_v6 = vpop.f32.mrf.mxu0 }

// kernel: cbow_forward.2
= control target key start
LH: loop header
LB: loop body
LE: loop exit
PB: predicated region body
PF: predicated region fallthrough
CT: control target
= control target key end

     0   :  { %s1554_s12 = smov [#allocation5]   ;;  %s1697_s0 = inlined_call_operand.vmem [shape: s32[4,6], index: 0, kind: input, shape index: {}]   ;;  %s1698_s1 = inlined_call_operand.vmem [shape: f32[64,16], index: 1, kind: input, shape index: {}]   ;;  %s1699_s2 = inlined_call_operand.vmem [shape: f32[8,16], index: 2, kind: output, shape index: {}]  }
   0x1   :  { %s8_s11 = sshll.u32 %s1697_s0, 4  ;;  %s9_s11 = int_to_ptr.vmem [resolvable:$true] %s8_s11 }
   0x2   :  { %11 = dma.vmem_to_smem %s9_s11, 64, %s1554_s12, [#allocation4] }
   0x3   :  { %1504 = dma.done.wait [#allocation4], 64 }
   0x4   :  { %1505 = vsyncadd [#allocation4], 4294967232 }
   0x5   :  { %14 = sfence }
   0x6   :  { %s15_s13 = sld [smem:[#allocation5]] }
   0xc   :  { %s16_s16 = scalar_lea.vmem %s1698_s1, %s15_s13 }
   0xd   :  { %v31_v0 = vld [vmem:[%s16_s16] sm:$0x1] }
   0xe   :  { %32 = vst [vmem:[#allocation2] sm:$0x1] %v31_v0 }
   0xf   :  { %50 = vsyncadd [#allocation3], 16  ;;  %s1431_s17 = sld [smem:[#allocation5 + $0x1]] }
  0x15   :  { %s52_s20 = scalar_lea.vmem %s1698_s1, %s1431_s17 }
  0x16   :  { %v69_v1 = vld [vmem:[%s52_s20] sm:$0x1] }
  0x17   :  { %70 = vst [vmem:[#allocation2 + $0x1] sm:$0x1] %v69_v1 }
  0x18   :  { %88 = vsyncadd [#allocation3 + $0x1], 16  ;;  %s1432_s0 = sld [smem:[#allocation5 + $0x2]] }
  0x1e   :  { %s90_s23 = scalar_lea.vmem %s1698_s1, %s1432_s0 }
  0x1f   :  { %v107_v2 = vld [vmem:[%s90_s23] sm:$0x1] }
  0x20   :  { %108 = vst [vmem:[#allocation2 + $0x2] sm:$0x1] %v107_v2 }
  0x21   :  { %126 = vsyncadd [#allocation3 + $0x2], 16  ;;  %s1433_s24 = sld [smem:[#allocation5 + $0x3]] }
  0x27   :  { %s128_s27 = scalar_lea.vmem %s1698_s1, %s1433_s24 }
  0x28   :  { %v145_v3 = vld [vmem:[%s128_s27] sm:$0x1] }
  0x29   :  { %146 = vst [vmem:[#allocation2 + $0x3] sm:$0x1] %v145_v3 }
  0x2a   :  { %164 = vsyncadd [#allocation3 + $0x3], 16  ;;  %s1434_s28 = sld [smem:[#allocation5 + $0x4]] }
  0x30   :  { %s166_s3 = scalar_lea.vmem %s1698_s1, %s1434_s28 }
  0x31   :  { %v183_v4 = vld [vmem:[%s166_s3] sm:$0x1] }
  0x32   :  { %184 = vst [vmem:[#allocation2 + $0x4] sm:$0x1] %v183_v4 }
  0x33   :  { %202 = vsyncadd [#allocation3 + $0x4], 16  ;;  %s1435_s4 = sld [smem:[#allocation5 + $0x5]] }
  0x39   :  { %s204_s7 = scalar_lea.vmem %s1698_s1, %s1435_s4 }
  0x3a   :  { %v221_v5 = vld [vmem:[%s204_s7] sm:$0x1] }
  0x3b   :  { %222 = vst [vmem:[#allocation2 + $0x5] sm:$0x1] %v221_v5 }
  0x3c   :  { %240 = vsyncadd [#allocation3 + $0x5], 16  ;;  %s1436_s8 = sld [smem:[#allocation5 + $0x80]] }
  0x42   :  { %s242_s11 = scalar_lea.vmem %s1698_s1, %s1436_s8 }
  0x43   :  { %v259_v6 = vld [vmem:[%s242_s11] sm:$0x1] }
  0x44   :  { %260 = vst [vmem:[#allocation2 + $0x6] sm:$0x1] %v259_v6 }
  0x45   :  { %278 = vsyncadd [#allocation3 + $0x6], 16  ;;  %s1437_s12 = sld [smem:[#allocation5 + $0x81]] }
  0x4b   :  { %s280_s15 = scalar_lea.vmem %s1698_s1, %s1437_s12 }
  0x4c   :  { %v297_v7 = vld [vmem:[%s280_s15] sm:$0x1] }
  0x4d   :  { %298 = vst [vmem:[#allocation2 + $0x7] sm:$0x1] %v297_v7 }
  0x4e   :  { %316 = vsyncadd [#allocation3 + $0x7], 16  ;;  %s1438_s16 = sld [smem:[#allocation5 + $0x82]] }
  0x54   :  { %s318_s19 = scalar_lea.vmem %s1698_s1, %s1438_s16 }
  0x55   :  { %v335_v8 = vld [vmem:[%s318_s19] sm:$0x1] }
  0x56   :  { %336 = vst [vmem:[#allocation2 + $0x8] sm:$0x1] %v335_v8 }
  0x57   :  { %354 = vsyncadd [#allocation3 + $0x8], 16  ;;  %s1439_s20 = sld [smem:[#allocation5 + $0x83]] }
  0x5d   :  { %s356_s22 = scalar_lea.vmem %s1698_s1, %s1439_s20 }
  0x5e   :  { %v373_v9 = vld [vmem:[%s356_s22] sm:$0x1] }
  0x5f   :  { %374 = vst [vmem:[#allocation2 + $0x9] sm:$0x1] %v373_v9 }
  0x60   :  { %392 = vsyncadd [#allocation3 + $0x9], 16  ;;  %s1440_s23 = sld [smem:[#allocation5 + $0x84]] }
  0x66   :  { %s394_s26 = scalar_lea.vmem %s1698_s1, %s1440_s23 }
  0x67   :  { %v411_v10 = vld [vmem:[%s394_s26] sm:$0x1] }
  0x68   :  { %412 = vst [vmem:[#allocation2 + $0xa] sm:$0x1] %v411_v10 }
  0x69   :  { %430 = vsyncadd [#allocation3 + $0xa], 16  ;;  %s1441_s27 = sld [smem:[#allocation5 + $0x85]] }
  0x6f   :  { %s432_s30 = scalar_lea.vmem %s1698_s1, %s1441_s27 }
  0x70   :  { %v449_v11 = vld [vmem:[%s432_s30] sm:$0x1] }
  0x71   :  { %450 = vst [vmem:[#allocation2 + $0xb] sm:$0x1] %v449_v11 }
  0x72   :  { %468 = vsyncadd [#allocation3 + $0xb], 16  ;;  %s1442_s3 = sld [smem:[#allocation5 + $0x100]] }
  0x78   :  { %s470_s6 = scalar_lea.vmem %s1698_s1, %s1442_s3 }
  0x79   :  { %v487_v12 = vld [vmem:[%s470_s6] sm:$0x1] }
  0x7a   :  { %488 = vst [vmem:[#allocation2 + $0xc] sm:$0x1] %v487_v12 }
  0x7b   :  { %506 = vsyncadd [#allocation3 + $0xc], 16  ;;  %s1443_s7 = sld [smem:[#allocation5 + $0x101]] }
  0x81   :  { %s508_s10 = scalar_lea.vmem %s1698_s1, %s1443_s7 }
  0x82   :  { %v525_v13 = vld [vmem:[%s508_s10] sm:$0x1] }
  0x83   :  { %526 = vst [vmem:[#allocation2 + $0xd] sm:$0x1] %v525_v13 }
  0x84   :  { %544 = vsyncadd [#allocation3 + $0xd], 16  ;;  %s1444_s11 = sld [smem:[#allocation5 + $0x102]] }
  0x8a   :  { %s546_s14 = scalar_lea.vmem %s1698_s1, %s1444_s11 }
  0x8b   :  { %v563_v14 = vld [vmem:[%s546_s14] sm:$0x1] }
  0x8c   :  { %564 = vst [vmem:[#allocation2 + $0xe] sm:$0x1] %v563_v14 }
  0x8d   :  { %582 = vsyncadd [#allocation3 + $0xe], 16  ;;  %s1445_s15 = sld [smem:[#allocation5 + $0x103]] }
  0x93   :  { %s584_s18 = scalar_lea.vmem %s1698_s1, %s1445_s15 }
  0x94   :  { %v601_v15 = vld [vmem:[%s584_s18] sm:$0x1] }
  0x95   :  { %602 = vst [vmem:[#allocation2 + $0xf] sm:$0x1] %v601_v15 }
  0x96   :  { %620 = vsyncadd [#allocation3 + $0xf], 16  ;;  %s1446_s19 = sld [smem:[#allocation5 + $0x104]] }
  0x9c   :  { %s622_s21 = scalar_lea.vmem %s1698_s1, %s1446_s19 }
  0x9d   :  { %v639_v16 = vld [vmem:[%s622_s21] sm:$0x1] }
  0x9e   :  { %640 = vst [vmem:[#allocation2 + $0x10] sm:$0x1] %v639_v16 }
  0x9f   :  { %658 = vsyncadd [#allocation3 + $0x10], 16  ;;  %s1447_s22 = sld [smem:[#allocation5 + $0x105]] }
  0xa5   :  { %s660_s25 = scalar_lea.vmem %s1698_s1, %s1447_s22 }
  0xa6   :  { %v677_v17 = vld [vmem:[%s660_s25] sm:$0x1] }
  0xa7   :  { %678 = vst [vmem:[#allocation2 + $0x11] sm:$0x1] %v677_v17 }
  0xa8   :  { %696 = vsyncadd [#allocation3 + $0x11], 16  ;;  %s1448_s26 = sld [smem:[#allocation5 + $0x180]] }
  0xae   :  { %s698_s29 = scalar_lea.vmem %s1698_s1, %s1448_s26 }
  0xaf   :  { %v715_v18 = vld [vmem:[%s698_s29] sm:$0x1] }
  0xb0   :  { %716 = vst [vmem:[#allocation2 + $0x12] sm:$0x1] %v715_v18 }
  0xb1   :  { %734 = vsyncadd [#allocation3 + $0x12], 16  ;;  %s1449_s30 = sld [smem:[#allocation5 + $0x181]] }
  0xb7   :  { %s736_s5 = scalar_lea.vmem %s1698_s1, %s1449_s30 }
  0xb8   :  { %v753_v19 = vld [vmem:[%s736_s5] sm:$0x1] }
  0xb9   :  { %754 = vst [vmem:[#allocation2 + $0x13] sm:$0x1] %v753_v19 }
  0xba   :  { %772 = vsyncadd [#allocation3 + $0x13], 16  ;;  %s1450_s6 = sld [smem:[#allocation5 + $0x182]] }
  0xc0   :  { %s774_s9 = scalar_lea.vmem %s1698_s1, %s1450_s6 }
  0xc1   :  { %v791_v20 = vld [vmem:[%s774_s9] sm:$0x1] }
  0xc2   :  { %792 = vst [vmem:[#allocation2 + $0x14] sm:$0x1] %v791_v20 }
  0xc3   :  { %810 = vsyncadd [#allocation3 + $0x14], 16  ;;  %s1451_s10 = sld [smem:[#allocation5 + $0x183]] }
  0xc9   :  { %s812_s13 = scalar_lea.vmem %s1698_s1, %s1451_s10 }
  0xca   :  { %v829_v21 = vld [vmem:[%s812_s13] sm:$0x1] }
  0xcb   :  { %830 = vst [vmem:[#allocation2 + $0x15] sm:$0x1] %v829_v21 }
  0xcc   :  { %848 = vsyncadd [#allocation3 + $0x15], 16  ;;  %s1452_s14 = sld [smem:[#allocation5 + $0x184]] }
  0xd2   :  { %s850_s17 = scalar_lea.vmem %s1698_s1, %s1452_s14 }
  0xd3   :  { %v867_v22 = vld [vmem:[%s850_s17] sm:$0x1] }
  0xd4   :  { %868 = vst [vmem:[#allocation2 + $0x16] sm:$0x1] %v867_v22 }
  0xd5   :  { %886 = vsyncadd [#allocation3 + $0x16], 16  ;;  %s1453_s18 = sld [smem:[#allocation5 + $0x185]] }
  0xdb   :  { %s888_s0 = scalar_lea.vmem %s1698_s1, %s1453_s18 }
  0xdc   :  { %v905_v23 = vld [vmem:[%s888_s0] sm:$0x1] }
  0xdd   :  { %906 = vst [vmem:[#allocation2 + $0x17] sm:$0x1] %v905_v23 }
  0xde   :  { %924 = vsyncadd [#allocation3 + $0x17], 16 }
  0xdf   :  { %1506 = dma.done.wait [#allocation3], 16 }
  0xe0   :  { %1507 = vsyncadd [#allocation3], 4294967280 }
  0xe1   :  { %1508 = dma.done.wait [#allocation3 + $0x1], 16 }
  0xe2   :  { %1509 = vsyncadd [#allocation3 + $0x1], 4294967280 }
  0xe3   :  { %1510 = dma.done.wait [#allocation3 + $0x2], 16 }
  0xe4   :  { %1511 = vsyncadd [#allocation3 + $0x2], 4294967280 }
  0xe5   :  { %1512 = dma.done.wait [#allocation3 + $0x3], 16 }
  0xe6   :  { %1513 = vsyncadd [#allocation3 + $0x3], 4294967280 }
  0xe7   :  { %1514 = dma.done.wait [#allocation3 + $0x4], 16 }
  0xe8   :  { %1515 = vsyncadd [#allocation3 + $0x4], 4294967280 }
  0xe9   :  { %1516 = dma.done.wait [#allocation3 + $0x5], 16 }
  0xea   :  { %1517 = vsyncadd [#allocation3 + $0x5], 4294967280 }
  0xeb   :  { %1518 = dma.done.wait [#allocation3 + $0x6], 16 }
  0xec   :  { %1519 = vsyncadd [#allocation3 + $0x6], 4294967280 }
  0xed   :  { %1520 = dma.done.wait [#allocation3 + $0x7], 16 }
  0xee   :  { %1521 = vsyncadd [#allocation3 + $0x7], 4294967280 }
  0xef   :  { %1522 = dma.done.wait [#allocation3 + $0x8], 16 }
  0xf0   :  { %1523 = vsyncadd [#allocation3 + $0x8], 4294967280 }
  0xf1   :  { %1524 = dma.done.wait [#allocation3 + $0x9], 16 }
  0xf2   :  { %1525 = vsyncadd [#allocation3 + $0x9], 4294967280 }
  0xf3   :  { %1526 = dma.done.wait [#allocation3 + $0xa], 16 }
  0xf4   :  { %1527 = vsyncadd [#allocation3 + $0xa], 4294967280 }
  0xf5   :  { %1528 = dma.done.wait [#allocation3 + $0xb], 16 }
  0xf6   :  { %1529 = vsyncadd [#allocation3 + $0xb], 4294967280 }
  0xf7   :  { %1530 = dma.done.wait [#allocation3 + $0xc], 16 }
  0xf8   :  { %1531 = vsyncadd [#allocation3 + $0xc], 4294967280 }
  0xf9   :  { %1532 = dma.done.wait [#allocation3 + $0xd], 16 }
  0xfa   :  { %1533 = vsyncadd [#allocation3 + $0xd], 4294967280 }
  0xfb   :  { %1534 = dma.done.wait [#allocation3 + $0xe], 16 }
  0xfc   :  { %1535 = vsyncadd [#allocation3 + $0xe], 4294967280 }
  0xfd   :  { %1536 = dma.done.wait [#allocation3 + $0xf], 16 }
  0xfe   :  { %1537 = vsyncadd [#allocation3 + $0xf], 4294967280 }
  0xff   :  { %1538 = dma.done.wait [#allocation3 + $0x10], 16 }
 0x100   :  { %1539 = vsyncadd [#allocation3 + $0x10], 4294967280 }
 0x101   :  { %1540 = dma.done.wait [#allocation3 + $0x11], 16 }
 0x102   :  { %1541 = vsyncadd [#allocation3 + $0x11], 4294967280 }
 0x103   :  { %1542 = dma.done.wait [#allocation3 + $0x12], 16 }
 0x104   :  { %1543 = vsyncadd [#allocation3 + $0x12], 4294967280 }
 0x105   :  { %1544 = dma.done.wait [#allocation3 + $0x13], 16 }
 0x106   :  { %1545 = vsyncadd [#allocation3 + $0x13], 4294967280 }
 0x107   :  { %1546 = dma.done.wait [#allocation3 + $0x14], 16 }
 0x108   :  { %1547 = vsyncadd [#allocation3 + $0x14], 4294967280 }
 0x109   :  { %1548 = dma.done.wait [#allocation3 + $0x15], 16 }
 0x10a   :  { %1549 = vsyncadd [#allocation3 + $0x15], 4294967280 }
 0x10b   :  { %1550 = dma.done.wait [#allocation3 + $0x16], 16 }
 0x10c   :  { %1551 = vsyncadd [#allocation3 + $0x16], 4294967280 }
 0x10d   :  { %1552 = dma.done.wait [#allocation3 + $0x17], 16 }
 0x10e   :  { %1553 = vsyncadd [#allocation3 + $0x17], 4294967280  ;;  %vm1092_vm0 = vcmask 122880   ;;  %v1555_v24 = vmov 0.0   ;;  %v1662_v25 = vld [vmem:[#allocation2 + $0x10] sm:$0xff]  ;;  %vm980_vm1 = vcmask 130048  }
 0x10f   :  { %1136 = vst.msk [vmem:[%s1699_s2 + $0x4] sm:$0x1] %vm1092_vm0, %v1555_v24  ;;  %v1664_v26 = vld [vmem:[#allocation2] sm:$0xff]  ;;  %v979_v27 = vmul.f32 %v1662_v25, %v1662_v25  ;;  %v1670_v29 = vld [vmem:[#allocation2 + $0x8] sm:$0xff] }
 0x110   :  { %1137 = vst.msk [vmem:[%s1699_s2 + $0x5] sm:$0x1] %vm1092_vm0, %v1555_v24  ;;  %v977_v28 = vmul.f32 %v1664_v26, %v1664_v26  ;;  %v978_v32 = vmul.f32 %v1670_v29, %v1670_v29 }
 0x111   :  { %1138 = vst.msk [vmem:[%s1699_s2 + $0x6] sm:$0x1] %vm1092_vm0, %v1555_v24  ;;  %v987_v30 = vsel %vm980_vm1, %v979_v27, 0.0 }
 0x112   :  { %1139 = vst.msk [vmem:[%s1699_s2 + $0x7] sm:$0x1] %vm1092_vm0, %v1555_v24  ;;  %v981_v31 = vsel %vm980_vm1, %v977_v28, 0.0  ;;  %988 = vadd.xlane.f32.xlu1 %v987_v30  ;;  %v984_v33 = vsel %vm980_vm1, %v978_v32, 0.0 }
 0x113   :  { %982 = vadd.xlane.f32.xlu0 %v981_v31 }
 0x11b   :  { %985 = vadd.xlane.f32.xlu0 %v984_v33 }
 0x185   :  { %v989_v34 = vpop.xlane.xlu1 %988 }
 0x186   :  { %v983_v35 = vpop.xlane.xlu0 %982  ;;  %1480 = vrsqrt.f32 %v989_v34  ;;  %vm1021_vm2 = vcmp.eq.f32.partialorder %v989_v34, inf  ;;  %vm1023_vm3 = vcmp.eq.f32.partialorder %v989_v34, 0.0  ;;  %v1024_v53 = vand.u32 2147483648, %v989_v34 }
 0x187   :  { %1482 = vrsqrt.f32 %v983_v35  ;;  %vm997_vm4 = vcmp.eq.f32.partialorder %v983_v35, inf  ;;  %v1000_v56 = vand.u32 2147483648, %v983_v35  ;;  %vm999_vm5 = vcmp.eq.f32.partialorder %v983_v35, 0.0 }
 0x18c   :  { %v1481_v36 = vpop.eup %1480 }
 0x18d   :  { %v1483_v37 = vpop.eup %1482  ;;  %v1015_v38 = vmul.f32 %v1481_v36, %v989_v34 }
 0x18e   :  { %v986_v39 = vpop.xlane.xlu0 %985  ;;  %v991_v40 = vmul.f32 %v1483_v37, %v983_v35 }
 0x18f   :  { %1484 = vrsqrt.f32 %v986_v39  ;;  %v1016_v41 = vmul.f32 %v1481_v36, %v1015_v38  ;;  %vm1009_vm6 = vcmp.eq.f32.partialorder %v986_v39, inf  ;;  %v1012_v2 = vand.u32 2147483648, %v986_v39 }
 0x190   :  { %v992_v42 = vmul.f32 %v1483_v37, %v991_v40  ;;  %vm1011_vm7 = vcmp.eq.f32.partialorder %v986_v39, 0.0 }
 0x191   :  { %v1017_v43 = vmul.f32 0.5, %v1016_v41 }
 0x192   :  { %v993_v44 = vmul.f32 0.5, %v992_v42 }
 0x193   :  { %v1018_v45 = vsub.f32 1.5, %v1017_v43 }
 0x194   :  { %v994_v47 = vsub.f32 1.5, %v993_v44 }
 0x195   :  { %v1485_v46 = vpop.eup %1484  ;;  %v1019_v48 = vmul.f32 %v1481_v36, %v1018_v45 }
 0x196   :  { %v1003_v49 = vmul.f32 %v1485_v46, %v986_v39  ;;  %v995_v50 = vmul.f32 %v1483_v37, %v994_v47 }
 0x197   :  { %v1020_v51 = vmul.f32 %v1019_v48, %v989_v34 }
 0x198   :  { %v1004_v52 = vmul.f32 %v1485_v46, %v1003_v49  ;;  %v996_v54 = vmul.f32 %v995_v50, %v983_v35 }
 0x199   :  { %v1022_v55 = vsel %vm1021_vm2, %v989_v34, %v1020_v51 }
 0x19a   :  { %v1005_v57 = vmul.f32 0.5, %v1004_v52  ;;  %v1025_v58 = vsel %vm1023_vm3, %v1024_v53, %v1022_v55  ;;  %v998_v59 = vsel %vm997_vm4, %v983_v35, %v996_v54  ;;  %vm1083_vm3 = vcmask 128000  }
 0x19b   :  { %v1031_v60 = vadd.f32 1e-07, %v1025_v58  ;;  %v1001_v61 = vsel %vm999_vm5, %v1000_v56, %v998_v59  ;;  %vm1028_vm15 = vcmp.gt.f32.partialorder %v1025_v58, 1.0 }
 0x19c   :  { %v1029_v62 = vadd.f32 1e-07, %v1001_v61  ;;  %v1006_v63 = vsub.f32 1.5, %v1005_v57  ;;  %vm1026_vm2 = vcmp.gt.f32.partialorder %v1001_v61, 1.0 }
 0x19d   :  { %1486 = vrcp.f32 %v1031_v60  ;;  %v1073_v11 = vand.u32 2147483648, %v1031_v60  ;;  %v1071_v14 = vand.u32 2147483647, %v1031_v60  ;;  %vm1067_vm10 = vweird.f32 %v1031_v60 }
 0x19e   :  { %1488 = vrcp.f32 %v1029_v62  ;;  %v1007_v0 = vmul.f32 %v1485_v46, %v1006_v63  ;;  %v1043_v15 = vand.u32 2147483648, %v1029_v62  ;;  %v1041_v17 = vand.u32 2147483647, %v1029_v62 }
 0x19f   :  { %v1074_v19 = vor.u32 1.1754944e-38, %v1073_v11  ;;  %vm1037_vm12 = vweird.f32 %v1029_v62  ;;  %vm1072_vm13 = vcmp.eq.f32.partialorder %v1071_v14, 8.507059e+37 }
 0x1a0   :  { %v1008_v1 = vmul.f32 %v1007_v0, %v986_v39  ;;  %v1044_v22 = vor.u32 1.1754944e-38, %v1043_v15  ;;  %vm1042_vm1 = vcmp.eq.f32.partialorder %v1041_v17, 8.507059e+37 }
 0x1a2   :  { %v1010_v4 = vsel %vm1009_vm6, %v986_v39, %v1008_v1 }
 0x1a3   :  { %v1487_v3 = vpop.eup %1486  ;;  %v1013_v7 = vsel %vm1011_vm7, %v1012_v2, %v1010_v4 }
 0x1a4   :  { %v1489_v5 = vpop.eup %1488  ;;  %v1063_v6 = vmul.f32 %v1487_v3, %v1031_v60  ;;  %v1030_v9 = vadd.f32 1e-07, %v1013_v7  ;;  %vm1068_vm8 = vweird.f32 %v1487_v3 }
 0x1a5   :  { %v1033_v8 = vmul.f32 %v1489_v5, %v1029_v62  ;;  %vm1038_vm9 = vweird.f32 %v1489_v5  ;;  %vm1069_vm11 = vmor %vm1067_vm10, %vm1068_vm8  ;;  %vm1027_vm8 = vcmp.gt.f32.partialorder %v1013_v7, 1.0  ;;  %vm1111_vm10 = vcmask 1043456  }
 0x1a6   :  { %v1064_v10 = vsub.f32 1.0, %v1063_v6  ;;  %1490 = vrcp.f32 %v1030_v9  ;;  %vm1039_vm14 = vmor %vm1037_vm12, %vm1038_vm9  ;;  %v1058_v37 = vand.u32 2147483648, %v1030_v9  ;;  %v1056_v40 = vand.u32 2147483647, %v1030_v9 }
 0x1a7   :  { %v1034_v12 = vsub.f32 1.0, %v1033_v8  ;;  %vm1052_vm5 = vweird.f32 %v1030_v9  ;;  %vm1096_vm9 = vcmask 1041408  }
 0x1a8   :  { %v1065_v13 = vmul.f32 %v1487_v3, %v1064_v10  ;;  %vm1057_vm7 = vcmp.eq.f32.partialorder %v1056_v40, 8.507059e+37 }
 0x1a9   :  { %v1035_v16 = vmul.f32 %v1489_v5, %v1034_v12 }
 0x1aa   :  { %v1066_v18 = vadd.f32 %v1487_v3, %v1065_v13 }
 0x1ab   :  { %v1036_v20 = vadd.f32 %v1489_v5, %v1035_v16 }
 0x1ac   :  { %v1070_v21 = vsel %vm1069_vm11, %v1487_v3, %v1066_v18  ;;  %v1491_v23 = vpop.eup %1490 }
 0x1ad   :  { %v1075_v24 = vsel %vm1072_vm13, %v1074_v19, %v1070_v21  ;;  %v1040_v27 = vsel %vm1039_vm14, %v1489_v5, %v1036_v20  ;;  %v1048_v31 = vmul.f32 %v1491_v23, %v1030_v9  ;;  %vm1053_vm4 = vweird.f32 %v1491_v23 }
 0x1ae   :  { %v1079_v28 = vsel %vm1028_vm15, %v1075_v24, 1.0  ;;  %v1045_v30 = vsel %vm1042_vm1, %v1044_v22, %v1040_v27  ;;  %vm1054_vm6 = vmor %vm1052_vm5, %vm1053_vm4 }
 0x1af   :  { %v1082_v32 = vmul.f32 %v1079_v28, %v1662_v25  ;;  %v1077_v33 = vsel %vm1026_vm2, %v1045_v30, 1.0  ;;  %v1049_v35 = vsub.f32 1.0, %v1048_v31  ;;  %v1059_v25 = vor.u32 1.1754944e-38, %v1058_v37 }
 0x1b0   :  { %v1080_v34 = vmul.f32 %v1077_v33, %v1664_v26 }
 0x1b1   :  { %v1125_v36 = vrot.slane %v1082_v32, 2  ;;  %v1050_v39 = vmul.f32 %v1491_v23, %v1049_v35  ;;  %v1113_v53 = vrot.slane %v1082_v32, 4 }
 0x1b2   :  { %v1084_v38 = vsel %vm1083_vm3, %v1080_v34, 0.0  ;;  %v1097_v56 = vrot.slane %v1080_v34, 6 }
 0x1b3   :  { %v1127_v41 = vsel %vm1083_vm3, %v1125_v36, 0.0  ;;  %v1085_v42 = vrot.slane %v1084_v38, 4  ;;  %v1051_v44 = vadd.f32 %v1491_v23, %v1050_v39 }
 0x1b4   :  { %v1128_v43 = vrot.slane %v1127_v41, 4 }
 0x1b5   :  { %v1086_v45 = vadd.f32 %v1085_v42, %v1084_v38  ;;  %v1055_v47 = vsel %vm1054_vm6, %v1491_v23, %v1051_v44 }
 0x1b6   :  { %v1129_v46 = vadd.f32 %v1128_v43, %v1127_v41  ;;  %v1060_v48 = vsel %vm1057_vm7, %v1059_v25, %v1055_v47 }
 0x1b7   :  { %v1087_v26 = vrot.slane %v1086_v45, 2  ;;  %v1078_v50 = vsel %vm1027_vm8, %v1060_v48, 1.0 }
 0x1b8   :  { %v1130_v49 = vrot.slane %v1129_v46, 2  ;;  %v1081_v52 = vmul.f32 %v1078_v50, %v1670_v29 }
 0x1b9   :  { %v1088_v51 = vadd.f32 %v1087_v26, %v1086_v45 }
 0x1ba   :  { %v1131_v54 = vadd.f32 %v1130_v49, %v1129_v46  ;;  %v1098_v57 = vrot.slane %v1081_v52, 6  ;;  %v1112_v58 = vrot.slane %v1081_v52, 4 }
 0x1bb   :  { %v1089_v55 = vrot.slane %v1088_v51, 1 }
 0x1bc   :  { %v1132_v59 = vrot.slane %v1131_v54, 1  ;;  %v1099_v61 = vsel %vm1096_vm9, %v1097_v56, %v1098_v57  ;;  %v1114_v62 = vsel %vm1111_vm10, %v1112_v58, %v1113_v53 }
 0x1bd   :  { %v1090_v60 = vadd.f32 %v1089_v55, %v1088_v51  ;;  %v1101_v0 = vsel %vm1083_vm3, %v1099_v61, 0.0  ;;  %v1116_v1 = vsel %vm1083_vm3, %v1114_v62, 0.0 }
 0x1be   :  { %v1133_v63 = vadd.f32 %v1132_v59, %v1131_v54  ;;  %v1102_v3 = vrot.slane %v1101_v0, 4  ;;  %v1117_v29 = vrot.slane %v1116_v1, 4 }
 0x1bf   :  { %v1091_v2 = vmul.f32 0.16666667, %v1090_v60 }
 0x1c0   :  { %v1134_v4 = vmul.f32 0.16666667, %v1133_v63  ;;  %v1103_v5 = vadd.f32 %v1102_v3, %v1101_v0  ;;  %v1118_v6 = vadd.f32 %v1117_v29, %v1116_v1 }
 0x1c1   :  { %1093 = vst.msk [vmem:[%s1699_s2] sm:$0x1] %vm1092_vm0, %v1091_v2 }
 0x1c2   :  { %1135 = vst.msk [vmem:[%s1699_s2 + $0x3] sm:$0x1] %vm1092_vm0, %v1134_v4  ;;  %v1104_v7 = vrot.slane %v1103_v5, 2  ;;  %v1119_v8 = vrot.slane %v1118_v6, 2 }
 0x1c4   :  { %v1105_v9 = vadd.f32 %v1104_v7, %v1103_v5  ;;  %v1120_v10 = vadd.f32 %v1119_v8, %v1118_v6 }
 0x1c6   :  { %v1106_v11 = vrot.slane %v1105_v9, 1  ;;  %v1121_v12 = vrot.slane %v1120_v10, 1 }
 0x1c8   :  { %v1107_v13 = vadd.f32 %v1106_v11, %v1105_v9  ;;  %v1122_v14 = vadd.f32 %v1121_v12, %v1120_v10 }
 0x1ca   :  { %v1108_v15 = vmul.f32 0.16666667, %v1107_v13  ;;  %v1123_v16 = vmul.f32 0.16666667, %v1122_v14 }
 0x1cc   :  { %1109 = vst.msk [vmem:[%s1699_s2 + $0x1] sm:$0x1] %vm1092_vm0, %v1108_v15 }
 0x1cd   :  { %1124 = vst.msk [vmem:[%s1699_s2 + $0x2] sm:$0x1] %vm1092_vm0, %v1123_v16 }
 0x1ce   :  { %1144 = vsyncmov [#allocation3] }
 0x1d1   :  { %s1145_s8 = vpop.sfrf %1144 }
 0x1d2   :  { %p1454_p0 = scmp.ne.s32.totalorder %s1145_s8, 0 }
 0x1d4   :  { %1149 = shalt.err (%p1454_p0)  }
 0x1d5   :  { %1151 = vsyncmov [#allocation3 + $0x1] }
 0x1d8   :  { %s1152_s9 = vpop.sfrf %1151 }
 0x1d9   :  { %p1455_p1 = scmp.ne.s32.totalorder %s1152_s9, 0 }
 0x1db   :  { %1156 = shalt.err (%p1455_p1)  }
 0x1dc   :  { %1158 = vsyncmov [#allocation3 + $0x2] }
 0x1df   :  { %s1159_s10 = vpop.sfrf %1158 }
 0x1e0   :  { %p1456_p2 = scmp.ne.s32.totalorder %s1159_s10, 0 }
 0x1e2   :  { %1163 = shalt.err (%p1456_p2)  }
 0x1e3   :  { %1165 = vsyncmov [#allocation3 + $0x3] }
 0x1e6   :  { %s1166_s11 = vpop.sfrf %1165 }
 0x1e7   :  { %p1457_p3 = scmp.ne.s32.totalorder %s1166_s11, 0 }
 0x1e9   :  { %1170 = shalt.err (%p1457_p3)  }
 0x1ea   :  { %1172 = vsyncmov [#allocation3 + $0x4] }
 0x1ed   :  { %s1173_s12 = vpop.sfrf %1172 }
 0x1ee   :  { %p1458_p4 = scmp.ne.s32.totalorder %s1173_s12, 0 }
 0x1f0   :  { %1177 = shalt.err (%p1458_p4)  }
 0x1f1   :  { %1179 = vsyncmov [#allocation3 + $0x5] }
 0x1f4   :  { %s1180_s2 = vpop.sfrf %1179 }
 0x1f5   :  { %p1459_p5 = scmp.ne.s32.totalorder %s1180_s2, 0 }
 0x1f7   :  { %1184 = shalt.err (%p1459_p5)  }
 0x1f8   :  { %1186 = vsyncmov [#allocation3 + $0x6] }
 0x1fb   :  { %s1187_s13 = vpop.sfrf %1186 }
 0x1fc   :  { %p1460_p6 = scmp.ne.s32.totalorder %s1187_s13, 0 }
 0x1fe   :  { %1191 = shalt.err (%p1460_p6)  }
 0x1ff   :  { %1193 = vsyncmov [#allocation3 + $0x7] }
 0x202   :  { %s1194_s14 = vpop.sfrf %1193 }
 0x203   :  { %p1461_p7 = scmp.ne.s32.totalorder %s1194_s14, 0 }
 0x205   :  { %1198 = shalt.err (%p1461_p7)  }
 0x206   :  { %1200 = vsyncmov [#allocation3 + $0x8] }
 0x209   :  { %s1201_s15 = vpop.sfrf %1200 }
 0x20a   :  { %p1462_p8 = scmp.ne.s32.totalorder %s1201_s15, 0 }
 0x20c   :  { %1205 = shalt.err (%p1462_p8)  }
 0x20d   :  { %1207 = vsyncmov [#allocation3 + $0x9] }
 0x210   :  { %s1208_s16 = vpop.sfrf %1207 }
 0x211   :  { %p1463_p9 = scmp.ne.s32.totalorder %s1208_s16, 0 }
 0x213   :  { %1212 = shalt.err (%p1463_p9)  }
 0x214   :  { %1214 = vsyncmov [#allocation3 + $0xa] }
 0x217   :  { %s1215_s17 = vpop.sfrf %1214 }
 0x218   :  { %p1464_p10 = scmp.ne.s32.totalorder %s1215_s17, 0 }
 0x21a   :  { %1219 = shalt.err (%p1464_p10)  }
 0x21b   :  { %1221 = vsyncmov [#allocation3 + $0xb] }
 0x21e   :  { %s1222_s18 = vpop.sfrf %1221 }
 0x21f   :  { %p1465_p11 = scmp.ne.s32.totalorder %s1222_s18, 0 }
 0x221   :  { %1226 = shalt.err (%p1465_p11)  }
 0x222   :  { %1228 = vsyncmov [#allocation3 + $0xc] }
 0x225   :  { %s1229_s19 = vpop.sfrf %1228 }
 0x226   :  { %p1466_p12 = scmp.ne.s32.totalorder %s1229_s19, 0 }
 0x228   :  { %1233 = shalt.err (%p1466_p12)  }
 0x229   :  { %1235 = vsyncmov [#allocation3 + $0xd] }
 0x22c   :  { %s1236_s20 = vpop.sfrf %1235 }
 0x22d   :  { %p1467_p13 = scmp.ne.s32.totalorder %s1236_s20, 0 }
 0x22f   :  { %1240 = shalt.err (%p1467_p13)  }
 0x230   :  { %1242 = vsyncmov [#allocation3 + $0xe] }
 0x233   :  { %s1243_s0 = vpop.sfrf %1242 }
 0x234   :  { %p1468_p0 = scmp.ne.s32.totalorder %s1243_s0, 0 }
 0x236   :  { %1247 = shalt.err (%p1468_p0)  }
 0x237   :  { %1249 = vsyncmov [#allocation3 + $0xf] }
 0x23a   :  { %s1250_s1 = vpop.sfrf %1249 }
 0x23b   :  { %p1469_p1 = scmp.ne.s32.totalorder %s1250_s1, 0 }
 0x23d   :  { %1254 = shalt.err (%p1469_p1)  }
 0x23e   :  { %1256 = vsyncmov [#allocation3 + $0x10] }
 0x241   :  { %s1257_s21 = vpop.sfrf %1256 }
 0x242   :  { %p1470_p2 = scmp.ne.s32.totalorder %s1257_s21, 0 }
 0x244   :  { %1261 = shalt.err (%p1470_p2)  }
 0x245   :  { %1263 = vsyncmov [#allocation3 + $0x11] }
 0x248   :  { %s1264_s22 = vpop.sfrf %1263 }
 0x249   :  { %p1471_p3 = scmp.ne.s32.totalorder %s1264_s22, 0 }
 0x24b   :  { %1268 = shalt.err (%p1471_p3)  }
 0x24c   :  { %1270 = vsyncmov [#allocation3 + $0x12] }
 0x24f   :  { %s1271_s23 = vpop.sfrf %1270 }
 0x250   :  { %p1472_p4 = scmp.ne.s32.totalorder %s1271_s23, 0 }
 0x252   :  { %1275 = shalt.err (%p1472_p4)  }
 0x253   :  { %1277 = vsyncmov [#allocation3 + $0x13] }
 0x256   :  { %s1278_s24 = vpop.sfrf %1277 }
 0x257   :  { %p1473_p5 = scmp.ne.s32.totalorder %s1278_s24, 0 }
 0x259   :  { %1282 = shalt.err (%p1473_p5)  }
 0x25a   :  { %1284 = vsyncmov [#allocation3 + $0x14] }
 0x25d   :  { %s1285_s25 = vpop.sfrf %1284 }
 0x25e   :  { %p1474_p6 = scmp.ne.s32.totalorder %s1285_s25, 0 }
 0x260   :  { %1289 = shalt.err (%p1474_p6)  }
 0x261   :  { %1291 = vsyncmov [#allocation3 + $0x15] }
 0x264   :  { %s1292_s26 = vpop.sfrf %1291 }
 0x265   :  { %p1475_p7 = scmp.ne.s32.totalorder %s1292_s26, 0 }
 0x267   :  { %1296 = shalt.err (%p1475_p7)  }
 0x268   :  { %1298 = vsyncmov [#allocation3 + $0x16] }
 0x26b   :  { %s1299_s27 = vpop.sfrf %1298 }
 0x26c   :  { %p1476_p8 = scmp.ne.s32.totalorder %s1299_s27, 0 }
 0x26e   :  { %1303 = shalt.err (%p1476_p8)  }
 0x26f   :  { %1305 = vsyncmov [#allocation3 + $0x17] }
 0x272   :  { %s1306_s28 = vpop.sfrf %1305 }
 0x273   :  { %p1477_p9 = scmp.ne.s32.totalorder %s1306_s28, 0 }
 0x275   :  { %1310 = shalt.err (%p1477_p9)  }

</bundles_post_ra>
